<compile_context>
chip_gen: v7x
topology: tpu7x:2x2x1
jax: 0.10.0
libtpu: 0.0.40
codegen_flags: <defaults>
</compile_context>

<pallas_src>
import functools

import jax
import jax.numpy as jnp
from jax.experimental import pallas as pl
from jax.experimental.pallas import tpu as pltpu


# -----------------------------------------------------------------------------
# Kernel
# -----------------------------------------------------------------------------
def _adv_wrapper_kernel(x_ref, w1_ref, b1_ref, w2_ref, b2_ref, out_ref, *,
                        hw, hidden, hw_tile, compute_dtype):
    """Fused (pre-folded) normalize + 1x1 conv + ReLU + global-avg-pool + linear.

    Block shapes:
      x_ref  : [Bt, 3*HW]     bf16/f32 (batch on sublanes, channel-major spatial on lanes)
      w1_ref : [3, hidden]    f32 in SMEM (normalization folded in) -> scalar splats
      b1_ref : [hidden]       f32 in SMEM (normalization folded in)
      w2_ref : [hidden, CP]   f32, classes zero-padded to CP, 1/HW folded in
      b2_ref : [1, CP]        f32
      out_ref: [Bt, CP]       f32 (lane-dense store)
    """
    bt = x_ref.shape[0]
    cdt = compute_dtype

    # Hoist the tiny conv weights out of all loops: scalar reads from SMEM, cast
    # once to the VPU compute dtype (bf16 on v6e/v7x, f32 on older chips).
    w = [[w1_ref[c, j].astype(cdt) for c in range(3)] for j in range(hidden)]
    b = [b1_ref[j].astype(cdt) for j in range(hidden)]

    acc = jnp.zeros((bt, hidden), jnp.float32)           # pool sums (f32 accumulate)

    # Spatial chunking: the [Bt, hidden, HW] activation never materializes; per
    # (chunk, hidden-channel) only a [Bt, hw_tile] temp lives in vregs.
    # TODO(synk): for very large HW a lax.fori_loop over aligned chunks would bound
    #             the unrolled code size; the Python unroll keeps all slices static.
    for off in range(0, hw, hw_tile):
        sz = min(hw_tile, hw - off)
        x0 = x_ref[:, 0 * hw + off: 0 * hw + off + sz].astype(cdt)
        x1 = x_ref[:, 1 * hw + off: 1 * hw + off + sz].astype(cdt)
        x2 = x_ref[:, 2 * hw + off: 2 * hw + off + sz].astype(cdt)
        cols = []
        for j in range(hidden):
            # 3 scalar-splat FMAs + bias + ReLU: pure VALU work, no sublane
            # broadcast of x across `hidden` (XLU stays free for the reduce).
            hj = jnp.maximum(w[j][0] * x0 + w[j][1] * x1 + w[j][2] * x2 + b[j], 0)
            # lane reduce on the XLU; accumulate in f32 regardless of compute dtype
            cols.append(jnp.sum(hj.astype(jnp.float32), axis=-1, keepdims=True))
        acc = acc + jnp.concatenate(cols, axis=-1)        # [Bt, hidden]

    # Classifier on the MXU; 1/HW already folded into w2, CP=128-padded -> dense store.
    logits = jnp.dot(acc, w2_ref[...], preferred_element_type=jnp.float32) + b2_ref[...]
    out_ref[...] = logits.astype(out_ref.dtype)


# -----------------------------------------------------------------------------
# Host-side helpers
# -----------------------------------------------------------------------------
def _vmem_capacity_bytes():
    try:
        return int(pltpu.get_tpu_info().vmem_capacity_bytes)
    except Exception:
        return 64 * 1024 * 1024   # conservative (v7x per-TC) fallback


def _default_compute_dtype():
    """bf16 VALU exists on v6e/v7x only; older generations compute in f32."""
    try:
        kind = jax.devices()[0].device_kind.lower()
    except Exception:
        return jnp.float32
    return jnp.bfloat16 if ("v6" in kind or "v7" in kind) else jnp.float32


def _fold_params(params, hw, classes_padded):
    """Fold (x-mean)/std into the conv weights, 1/HW into the classifier, pad lanes."""
    mean = params["mean"].reshape(3).astype(jnp.float32)
    istd = (1.0 / params["std"].reshape(3)).astype(jnp.float32)
    w1 = params["w1"].astype(jnp.float32)                      # [3, hidden]
    b1 = params["b1"].reshape(-1).astype(jnp.float32)          # [hidden]
    hidden = w1.shape[1]

    w1f = istd[:, None] * w1                                   # [3, hidden]
    b1f = b1 - (mean * istd) @ w1                              # [hidden]

    w2 = params["w2"].astype(jnp.float32)                      # [hidden, classes]
    b2 = params["b2"].reshape(-1).astype(jnp.float32)          # [classes]
    classes = w2.shape[1]
    w2p = jnp.zeros((hidden, classes_padded), jnp.float32).at[:, :classes].set(w2 / hw)
    b2p = jnp.zeros((1, classes_padded), jnp.float32).at[:, :classes].set(b2)
    return w1f, b1f, w2p, b2p


def adv_wrapper_forward(x_nchw, params, *, block_batch=None,
                        input_dtype=jnp.bfloat16, compute_dtype=None, hw_tile=512):
    """AdvWrapper forward.  x_nchw: [N, 3, H, W] float32 (PyTorch layout) -> [N, classes] f32.

    Default fast path uses bf16 input + (on v6e/v7x) bf16 VPU math; pass
    input_dtype=compute_dtype=jnp.float32 for f32-exact AdvWrapper semantics.
    """
    N, C, H, W = x_nchw.shape
    assert C == 3, "AdvWrapper normalization is defined for 3-channel (RGB) input"
    HW = H * W
    hidden = params["w1"].shape[1]
    classes = params["w2"].shape[1]
    CP = 128 * pl.cdiv(classes, 128)                            # lane-dense output width
    if compute_dtype is None:
        compute_dtype = _default_compute_dtype()

    w1f, b1f, w2p, b2p = _fold_params(params, HW, CP)

    # NCHW -> [N, 3*HW] is a free reshape (row-major): batch on sublanes (dense),
    # channel-major spatial on lanes.  Ship x narrow; kernel upcasts as needed.
    x = x_nchw.reshape(N, C * HW).astype(input_dtype)
    x_bytes = jnp.dtype(input_dtype).itemsize

    # --- batch-tile sizing against this generation's (per-TensorCore) VMEM budget ---
    vmem_cap = _vmem_capacity_bytes()                           # 128 MiB v5e/v6e, 64 MiB v7x
    vmem_limit = int(vmem_cap * 3 // 4)
    if block_batch is None:
        # double-buffered dense x block + double-buffered padded output row;
        # weights, the [Bt, hidden] accumulator and per-chunk temps are tiny.
        per_img = 2 * C * HW * x_bytes + 2 * CP * 4
        budget = int(vmem_limit * 0.8)                          # headroom for regalloc/scratch
        bt = budget // per_img
        if N > 8:
            # keep >= 2 grid steps (one per TensorCore on v7x; near-free elsewhere).
            # TODO(synk): switch to pltpu.CORE_PARALLEL if plain "parallel" is shown
            #             not to shard the batch axis across v7x TensorCores.
            bt = min(bt, 8 * pl.cdiv(pl.cdiv(N, 2), 8))
    else:
        bt = int(block_batch)
    bt = max(8, (bt // 8) * 8)                                  # round DOWN to sublane multiple
    bt = min(bt, 8 * pl.cdiv(N, 8))                             # never larger than padded batch

    Np = bt * pl.cdiv(N, bt)
    if Np != N:
        x = jnp.pad(x, ((0, Np - N), (0, 0)))

    hw_tile = int(min(hw_tile, HW))

    kernel = functools.partial(_adv_wrapper_kernel, hw=HW, hidden=hidden,
                               hw_tile=hw_tile, compute_dtype=compute_dtype)

    grid_spec = pltpu.PrefetchScalarGridSpec(
        num_scalar_prefetch=0,
        grid=(Np // bt,),
        in_specs=[
            pl.BlockSpec((bt, C * HW), lambda b: (b, 0)),               # x chunk (dense)
            pl.BlockSpec(memory_space=pltpu.MemorySpace.SMEM),          # folded conv weight
            pl.BlockSpec(memory_space=pltpu.MemorySpace.SMEM),          # folded conv bias
            pl.BlockSpec((hidden, CP), lambda b: (0, 0)),               # fc weight (padded, /HW)
            pl.BlockSpec((1, CP), lambda b: (0, 0)),                    # fc bias (padded)
        ],
        out_specs=pl.BlockSpec((bt, CP), lambda b: (b, 0)),
    )

    out = pl.pallas_call(
        kernel,
        out_shape=jax.ShapeDtypeStruct((Np, CP), jnp.float32),
        grid_spec=grid_spec,
        compiler_params=pltpu.CompilerParams(
            dimension_semantics=("parallel",),
            vmem_limit_bytes=vmem_limit,
        ),
    )(x, w1f, b1f, w2p, b2p)

    # AdvWrapper semantics: [N, classes].  (Serving code that tolerates the padded
    # [Np, CP] buffer can skip this slice and save an HBM round trip.)
    return out[:N, :classes]


# -----------------------------------------------------------------------------
# Pure-JAX reference and demo
# -----------------------------------------------------------------------------
def reference_forward(x_nchw, params):
    """Exact f32 reference matching PyTorch AdvWrapper + the synthetic model (NCHW)."""
    mean = params["mean"].reshape(1, 3, 1, 1)
    std = params["std"].reshape(1, 3, 1, 1)
    xn = (x_nchw - mean) / std
    h = (jnp.einsum("nchw,cd->ndhw", xn, params["w1"])
         + params["b1"].reshape(1, -1, 1, 1))
    h = jnp.maximum(h, 0.0)
    pooled = jnp.mean(h, axis=(2, 3))                           # [N, hidden]
    return pooled @ params["w2"] + params["b2"].reshape(1, -1)


def make_params(key, hidden=32, classes=8):
    k1, k2, k3, k4 = jax.random.split(key, 4)
    return {
        "mean": jnp.array([0.485, 0.456, 0.406], jnp.float32),
        "std": jnp.array([0.229, 0.224, 0.225], jnp.float32),
        "w1": jax.random.normal(k1, (3, hidden), jnp.float32) * 0.1,
        "b1": jax.random.normal(k2, (hidden,), jnp.float32) * 0.1,
        "w2": jax.random.normal(k3, (hidden, classes), jnp.float32) * 0.1,
        "b2": jax.random.normal(k4, (classes,), jnp.float32) * 0.1,
    }


if __name__ == "__main__":
    key = jax.random.PRNGKey(0)
    kx, kp = jax.random.split(key)

    N, C, H, W = 16, 3, 16, 16                 # small RGB batch; HW = 256 (lane-dense)
    x = jax.random.uniform(kx, (N, C, H, W), jnp.float32)
    params = make_params(kp, hidden=32, classes=8)

    ref = reference_forward(x, params)

    # Exact path: f32 input + f32 VPU math must match AdvWrapper semantics tightly.
    out_f32 = jax.block_until_ready(
        adv_wrapper_forward(x, params, input_dtype=jnp.float32,
                            compute_dtype=jnp.float32))
    assert out_f32.shape == (N, 8), out_f32.shape
    assert jnp.allclose(out_f32, ref, atol=1e-4, rtol=1e-4), \
        float(jnp.max(jnp.abs(out_f32 - ref)))

    # Fast path (auto: bf16 input, bf16 VPU math on v6e/v7x, f32 on older chips),
    # auto-sized tile (2 grid steps) vs. explicit single-tile grid.
    out_fast = jax.block_until_ready(adv_wrapper_forward(x, params))
    out_tile = jax.block_until_ready(adv_wrapper_forward(x, params, block_batch=16))
    assert out_fast.shape == (N, 8), out_fast.shape
    assert jnp.allclose(out_fast, out_tile, atol=1e-5, rtol=1e-5), "tile-size mismatch"
    assert jnp.allclose(out_fast, ref, atol=3e-2, rtol=3e-2), \
        float(jnp.max(jnp.abs(out_fast - ref)))

    print("KERNEL_OK")
</pallas_src>

<mosaic_0001>
module attributes {stable_mosaic.version = 11 : i64} {
  func.func @_adv_wrapper_kernel(%arg0: i32, %arg1: memref<8x768xf32, #tpu.memory_space<vmem>>, %arg2: memref<3x32xf32, #tpu.memory_space<smem>>, %arg3: memref<32xf32, #tpu.memory_space<smem>>, %arg4: memref<32x128xf32, #tpu.memory_space<vmem>>, %arg5: memref<1x128xf32, #tpu.memory_space<vmem>>, %arg6: memref<8x128xf32, #tpu.memory_space<vmem>>) attributes {dimension_semantics = [#tpu.dimension_semantics<parallel>], iteration_bounds = array<i64: 2>, scalar_prefetch = 0 : i64, scratch_operands = 0 : i64, tpu.core_type = #tpu.core_type<tc>, window_params = [{transform_indices = @transform_0, window_bounds = array<i64: 8, 768>}, {transform_indices = @transform_1, window_bounds = array<i64: 3, 32>}, {transform_indices = @transform_2, window_bounds = array<i64: 32>}, {pipeline_mode = #tpu.pipeline_mode<synchronous>, transform_indices = @transform_3, window_bounds = array<i64: 32, 128>}, {pipeline_mode = #tpu.pipeline_mode<synchronous>, transform_indices = @transform_4, window_bounds = array<i64: 1, 128>}, {transform_indices = @transform_5, window_bounds = array<i64: 8, 128>}]} {
    %c0 = arith.constant 0 : index
    %c0_0 = arith.constant 0 : index
    %0 = memref.load %arg2[%c0, %c0_0] : memref<3x32xf32, #tpu.memory_space<smem>>
    %c1 = arith.constant 1 : index
    %c0_1 = arith.constant 0 : index
    %1 = memref.load %arg2[%c1, %c0_1] : memref<3x32xf32, #tpu.memory_space<smem>>
    %c2 = arith.constant 2 : index
    %c0_2 = arith.constant 0 : index
    %2 = memref.load %arg2[%c2, %c0_2] : memref<3x32xf32, #tpu.memory_space<smem>>
    %c0_3 = arith.constant 0 : index
    %c1_4 = arith.constant 1 : index
    %3 = memref.load %arg2[%c0_3, %c1_4] : memref<3x32xf32, #tpu.memory_space<smem>>
    %c1_5 = arith.constant 1 : index
    %c1_6 = arith.constant 1 : index
    %4 = memref.load %arg2[%c1_5, %c1_6] : memref<3x32xf32, #tpu.memory_space<smem>>
    %c2_7 = arith.constant 2 : index
    %c1_8 = arith.constant 1 : index
    %5 = memref.load %arg2[%c2_7, %c1_8] : memref<3x32xf32, #tpu.memory_space<smem>>
    %c0_9 = arith.constant 0 : index
    %c2_10 = arith.constant 2 : index
    %6 = memref.load %arg2[%c0_9, %c2_10] : memref<3x32xf32, #tpu.memory_space<smem>>
    %c1_11 = arith.constant 1 : index
    %c2_12 = arith.constant 2 : index
    %7 = memref.load %arg2[%c1_11, %c2_12] : memref<3x32xf32, #tpu.memory_space<smem>>
    %c2_13 = arith.constant 2 : index
    %c2_14 = arith.constant 2 : index
    %8 = memref.load %arg2[%c2_13, %c2_14] : memref<3x32xf32, #tpu.memory_space<smem>>
    %c0_15 = arith.constant 0 : index
    %c3 = arith.constant 3 : index
    %9 = memref.load %arg2[%c0_15, %c3] : memref<3x32xf32, #tpu.memory_space<smem>>
    %c1_16 = arith.constant 1 : index
    %c3_17 = arith.constant 3 : index
    %10 = memref.load %arg2[%c1_16, %c3_17] : memref<3x32xf32, #tpu.memory_space<smem>>
    %c2_18 = arith.constant 2 : index
    %c3_19 = arith.constant 3 : index
    %11 = memref.load %arg2[%c2_18, %c3_19] : memref<3x32xf32, #tpu.memory_space<smem>>
    %c0_20 = arith.constant 0 : index
    %c4 = arith.constant 4 : index
    %12 = memref.load %arg2[%c0_20, %c4] : memref<3x32xf32, #tpu.memory_space<smem>>
    %c1_21 = arith.constant 1 : index
    %c4_22 = arith.constant 4 : index
    %13 = memref.load %arg2[%c1_21, %c4_22] : memref<3x32xf32, #tpu.memory_space<smem>>
    %c2_23 = arith.constant 2 : index
    %c4_24 = arith.constant 4 : index
    %14 = memref.load %arg2[%c2_23, %c4_24] : memref<3x32xf32, #tpu.memory_space<smem>>
    %c0_25 = arith.constant 0 : index
    %c5 = arith.constant 5 : index
    %15 = memref.load %arg2[%c0_25, %c5] : memref<3x32xf32, #tpu.memory_space<smem>>
    %c1_26 = arith.constant 1 : index
    %c5_27 = arith.constant 5 : index
    %16 = memref.load %arg2[%c1_26, %c5_27] : memref<3x32xf32, #tpu.memory_space<smem>>
    %c2_28 = arith.constant 2 : index
    %c5_29 = arith.constant 5 : index
    %17 = memref.load %arg2[%c2_28, %c5_29] : memref<3x32xf32, #tpu.memory_space<smem>>
    %c0_30 = arith.constant 0 : index
    %c6 = arith.constant 6 : index
    %18 = memref.load %arg2[%c0_30, %c6] : memref<3x32xf32, #tpu.memory_space<smem>>
    %c1_31 = arith.constant 1 : index
    %c6_32 = arith.constant 6 : index
    %19 = memref.load %arg2[%c1_31, %c6_32] : memref<3x32xf32, #tpu.memory_space<smem>>
    %c2_33 = arith.constant 2 : index
    %c6_34 = arith.constant 6 : index
    %20 = memref.load %arg2[%c2_33, %c6_34] : memref<3x32xf32, #tpu.memory_space<smem>>
    %c0_35 = arith.constant 0 : index
    %c7 = arith.constant 7 : index
    %21 = memref.load %arg2[%c0_35, %c7] : memref<3x32xf32, #tpu.memory_space<smem>>
    %c1_36 = arith.constant 1 : index
    %c7_37 = arith.constant 7 : index
    %22 = memref.load %arg2[%c1_36, %c7_37] : memref<3x32xf32, #tpu.memory_space<smem>>
    %c2_38 = arith.constant 2 : index
    %c7_39 = arith.constant 7 : index
    %23 = memref.load %arg2[%c2_38, %c7_39] : memref<3x32xf32, #tpu.memory_space<smem>>
    %c0_40 = arith.constant 0 : index
    %c8 = arith.constant 8 : index
    %24 = memref.load %arg2[%c0_40, %c8] : memref<3x32xf32, #tpu.memory_space<smem>>
    %c1_41 = arith.constant 1 : index
    %c8_42 = arith.constant 8 : index
    %25 = memref.load %arg2[%c1_41, %c8_42] : memref<3x32xf32, #tpu.memory_space<smem>>
    %c2_43 = arith.constant 2 : index
    %c8_44 = arith.constant 8 : index
    %26 = memref.load %arg2[%c2_43, %c8_44] : memref<3x32xf32, #tpu.memory_space<smem>>
    %c0_45 = arith.constant 0 : index
    %c9 = arith.constant 9 : index
    %27 = memref.load %arg2[%c0_45, %c9] : memref<3x32xf32, #tpu.memory_space<smem>>
    %c1_46 = arith.constant 1 : index
    %c9_47 = arith.constant 9 : index
    %28 = memref.load %arg2[%c1_46, %c9_47] : memref<3x32xf32, #tpu.memory_space<smem>>
    %c2_48 = arith.constant 2 : index
    %c9_49 = arith.constant 9 : index
    %29 = memref.load %arg2[%c2_48, %c9_49] : memref<3x32xf32, #tpu.memory_space<smem>>
    %c0_50 = arith.constant 0 : index
    %c10 = arith.constant 10 : index
    %30 = memref.load %arg2[%c0_50, %c10] : memref<3x32xf32, #tpu.memory_space<smem>>
    %c1_51 = arith.constant 1 : index
    %c10_52 = arith.constant 10 : index
    %31 = memref.load %arg2[%c1_51, %c10_52] : memref<3x32xf32, #tpu.memory_space<smem>>
    %c2_53 = arith.constant 2 : index
    %c10_54 = arith.constant 10 : index
    %32 = memref.load %arg2[%c2_53, %c10_54] : memref<3x32xf32, #tpu.memory_space<smem>>
    %c0_55 = arith.constant 0 : index
    %c11 = arith.constant 11 : index
    %33 = memref.load %arg2[%c0_55, %c11] : memref<3x32xf32, #tpu.memory_space<smem>>
    %c1_56 = arith.constant 1 : index
    %c11_57 = arith.constant 11 : index
    %34 = memref.load %arg2[%c1_56, %c11_57] : memref<3x32xf32, #tpu.memory_space<smem>>
    %c2_58 = arith.constant 2 : index
    %c11_59 = arith.constant 11 : index
    %35 = memref.load %arg2[%c2_58, %c11_59] : memref<3x32xf32, #tpu.memory_space<smem>>
    %c0_60 = arith.constant 0 : index
    %c12 = arith.constant 12 : index
    %36 = memref.load %arg2[%c0_60, %c12] : memref<3x32xf32, #tpu.memory_space<smem>>
    %c1_61 = arith.constant 1 : index
    %c12_62 = arith.constant 12 : index
    %37 = memref.load %arg2[%c1_61, %c12_62] : memref<3x32xf32, #tpu.memory_space<smem>>
    %c2_63 = arith.constant 2 : index
    %c12_64 = arith.constant 12 : index
    %38 = memref.load %arg2[%c2_63, %c12_64] : memref<3x32xf32, #tpu.memory_space<smem>>
    %c0_65 = arith.constant 0 : index
    %c13 = arith.constant 13 : index
    %39 = memref.load %arg2[%c0_65, %c13] : memref<3x32xf32, #tpu.memory_space<smem>>
    %c1_66 = arith.constant 1 : index
    %c13_67 = arith.constant 13 : index
    %40 = memref.load %arg2[%c1_66, %c13_67] : memref<3x32xf32, #tpu.memory_space<smem>>
    %c2_68 = arith.constant 2 : index
    %c13_69 = arith.constant 13 : index
    %41 = memref.load %arg2[%c2_68, %c13_69] : memref<3x32xf32, #tpu.memory_space<smem>>
    %c0_70 = arith.constant 0 : index
    %c14 = arith.constant 14 : index
    %42 = memref.load %arg2[%c0_70, %c14] : memref<3x32xf32, #tpu.memory_space<smem>>
    %c1_71 = arith.constant 1 : index
    %c14_72 = arith.constant 14 : index
    %43 = memref.load %arg2[%c1_71, %c14_72] : memref<3x32xf32, #tpu.memory_space<smem>>
    %c2_73 = arith.constant 2 : index
    %c14_74 = arith.constant 14 : index
    %44 = memref.load %arg2[%c2_73, %c14_74] : memref<3x32xf32, #tpu.memory_space<smem>>
    %c0_75 = arith.constant 0 : index
    %c15 = arith.constant 15 : index
    %45 = memref.load %arg2[%c0_75, %c15] : memref<3x32xf32, #tpu.memory_space<smem>>
    %c1_76 = arith.constant 1 : index
    %c15_77 = arith.constant 15 : index
    %46 = memref.load %arg2[%c1_76, %c15_77] : memref<3x32xf32, #tpu.memory_space<smem>>
    %c2_78 = arith.constant 2 : index
    %c15_79 = arith.constant 15 : index
    %47 = memref.load %arg2[%c2_78, %c15_79] : memref<3x32xf32, #tpu.memory_space<smem>>
    %c0_80 = arith.constant 0 : index
    %c16 = arith.constant 16 : index
    %48 = memref.load %arg2[%c0_80, %c16] : memref<3x32xf32, #tpu.memory_space<smem>>
    %c1_81 = arith.constant 1 : index
    %c16_82 = arith.constant 16 : index
    %49 = memref.load %arg2[%c1_81, %c16_82] : memref<3x32xf32, #tpu.memory_space<smem>>
    %c2_83 = arith.constant 2 : index
    %c16_84 = arith.constant 16 : index
    %50 = memref.load %arg2[%c2_83, %c16_84] : memref<3x32xf32, #tpu.memory_space<smem>>
    %c0_85 = arith.constant 0 : index
    %c17 = arith.constant 17 : index
    %51 = memref.load %arg2[%c0_85, %c17] : memref<3x32xf32, #tpu.memory_space<smem>>
    %c1_86 = arith.constant 1 : index
    %c17_87 = arith.constant 17 : index
    %52 = memref.load %arg2[%c1_86, %c17_87] : memref<3x32xf32, #tpu.memory_space<smem>>
    %c2_88 = arith.constant 2 : index
    %c17_89 = arith.constant 17 : index
    %53 = memref.load %arg2[%c2_88, %c17_89] : memref<3x32xf32, #tpu.memory_space<smem>>
    %c0_90 = arith.constant 0 : index
    %c18 = arith.constant 18 : index
    %54 = memref.load %arg2[%c0_90, %c18] : memref<3x32xf32, #tpu.memory_space<smem>>
    %c1_91 = arith.constant 1 : index
    %c18_92 = arith.constant 18 : index
    %55 = memref.load %arg2[%c1_91, %c18_92] : memref<3x32xf32, #tpu.memory_space<smem>>
    %c2_93 = arith.constant 2 : index
    %c18_94 = arith.constant 18 : index
    %56 = memref.load %arg2[%c2_93, %c18_94] : memref<3x32xf32, #tpu.memory_space<smem>>
    %c0_95 = arith.constant 0 : index
    %c19 = arith.constant 19 : index
    %57 = memref.load %arg2[%c0_95, %c19] : memref<3x32xf32, #tpu.memory_space<smem>>
    %c1_96 = arith.constant 1 : index
    %c19_97 = arith.constant 19 : index
    %58 = memref.load %arg2[%c1_96, %c19_97] : memref<3x32xf32, #tpu.memory_space<smem>>
    %c2_98 = arith.constant 2 : index
    %c19_99 = arith.constant 19 : index
    %59 = memref.load %arg2[%c2_98, %c19_99] : memref<3x32xf32, #tpu.memory_space<smem>>
    %c0_100 = arith.constant 0 : index
    %c20 = arith.constant 20 : index
    %60 = memref.load %arg2[%c0_100, %c20] : memref<3x32xf32, #tpu.memory_space<smem>>
    %c1_101 = arith.constant 1 : index
    %c20_102 = arith.constant 20 : index
    %61 = memref.load %arg2[%c1_101, %c20_102] : memref<3x32xf32, #tpu.memory_space<smem>>
    %c2_103 = arith.constant 2 : index
    %c20_104 = arith.constant 20 : index
    %62 = memref.load %arg2[%c2_103, %c20_104] : memref<3x32xf32, #tpu.memory_space<smem>>
    %c0_105 = arith.constant 0 : index
    %c21 = arith.constant 21 : index
    %63 = memref.load %arg2[%c0_105, %c21] : memref<3x32xf32, #tpu.memory_space<smem>>
    %c1_106 = arith.constant 1 : index
    %c21_107 = arith.constant 21 : index
    %64 = memref.load %arg2[%c1_106, %c21_107] : memref<3x32xf32, #tpu.memory_space<smem>>
    %c2_108 = arith.constant 2 : index
    %c21_109 = arith.constant 21 : index
    %65 = memref.load %arg2[%c2_108, %c21_109] : memref<3x32xf32, #tpu.memory_space<smem>>
    %c0_110 = arith.constant 0 : index
    %c22 = arith.constant 22 : index
    %66 = memref.load %arg2[%c0_110, %c22] : memref<3x32xf32, #tpu.memory_space<smem>>
    %c1_111 = arith.constant 1 : index
    %c22_112 = arith.constant 22 : index
    %67 = memref.load %arg2[%c1_111, %c22_112] : memref<3x32xf32, #tpu.memory_space<smem>>
    %c2_113 = arith.constant 2 : index
    %c22_114 = arith.constant 22 : index
    %68 = memref.load %arg2[%c2_113, %c22_114] : memref<3x32xf32, #tpu.memory_space<smem>>
    %c0_115 = arith.constant 0 : index
    %c23 = arith.constant 23 : index
    %69 = memref.load %arg2[%c0_115, %c23] : memref<3x32xf32, #tpu.memory_space<smem>>
    %c1_116 = arith.constant 1 : index
    %c23_117 = arith.constant 23 : index
    %70 = memref.load %arg2[%c1_116, %c23_117] : memref<3x32xf32, #tpu.memory_space<smem>>
    %c2_118 = arith.constant 2 : index
    %c23_119 = arith.constant 23 : index
    %71 = memref.load %arg2[%c2_118, %c23_119] : memref<3x32xf32, #tpu.memory_space<smem>>
    %c0_120 = arith.constant 0 : index
    %c24 = arith.constant 24 : index
    %72 = memref.load %arg2[%c0_120, %c24] : memref<3x32xf32, #tpu.memory_space<smem>>
    %c1_121 = arith.constant 1 : index
    %c24_122 = arith.constant 24 : index
    %73 = memref.load %arg2[%c1_121, %c24_122] : memref<3x32xf32, #tpu.memory_space<smem>>
    %c2_123 = arith.constant 2 : index
    %c24_124 = arith.constant 24 : index
    %74 = memref.load %arg2[%c2_123, %c24_124] : memref<3x32xf32, #tpu.memory_space<smem>>
    %c0_125 = arith.constant 0 : index
    %c25 = arith.constant 25 : index
    %75 = memref.load %arg2[%c0_125, %c25] : memref<3x32xf32, #tpu.memory_space<smem>>
    %c1_126 = arith.constant 1 : index
    %c25_127 = arith.constant 25 : index
    %76 = memref.load %arg2[%c1_126, %c25_127] : memref<3x32xf32, #tpu.memory_space<smem>>
    %c2_128 = arith.constant 2 : index
    %c25_129 = arith.constant 25 : index
    %77 = memref.load %arg2[%c2_128, %c25_129] : memref<3x32xf32, #tpu.memory_space<smem>>
    %c0_130 = arith.constant 0 : index
    %c26 = arith.constant 26 : index
    %78 = memref.load %arg2[%c0_130, %c26] : memref<3x32xf32, #tpu.memory_space<smem>>
    %c1_131 = arith.constant 1 : index
    %c26_132 = arith.constant 26 : index
    %79 = memref.load %arg2[%c1_131, %c26_132] : memref<3x32xf32, #tpu.memory_space<smem>>
    %c2_133 = arith.constant 2 : index
    %c26_134 = arith.constant 26 : index
    %80 = memref.load %arg2[%c2_133, %c26_134] : memref<3x32xf32, #tpu.memory_space<smem>>
    %c0_135 = arith.constant 0 : index
    %c27 = arith.constant 27 : index
    %81 = memref.load %arg2[%c0_135, %c27] : memref<3x32xf32, #tpu.memory_space<smem>>
    %c1_136 = arith.constant 1 : index
    %c27_137 = arith.constant 27 : index
    %82 = memref.load %arg2[%c1_136, %c27_137] : memref<3x32xf32, #tpu.memory_space<smem>>
    %c2_138 = arith.constant 2 : index
    %c27_139 = arith.constant 27 : index
    %83 = memref.load %arg2[%c2_138, %c27_139] : memref<3x32xf32, #tpu.memory_space<smem>>
    %c0_140 = arith.constant 0 : index
    %c28 = arith.constant 28 : index
    %84 = memref.load %arg2[%c0_140, %c28] : memref<3x32xf32, #tpu.memory_space<smem>>
    %c1_141 = arith.constant 1 : index
    %c28_142 = arith.constant 28 : index
    %85 = memref.load %arg2[%c1_141, %c28_142] : memref<3x32xf32, #tpu.memory_space<smem>>
    %c2_143 = arith.constant 2 : index
    %c28_144 = arith.constant 28 : index
    %86 = memref.load %arg2[%c2_143, %c28_144] : memref<3x32xf32, #tpu.memory_space<smem>>
    %c0_145 = arith.constant 0 : index
    %c29 = arith.constant 29 : index
    %87 = memref.load %arg2[%c0_145, %c29] : memref<3x32xf32, #tpu.memory_space<smem>>
    %c1_146 = arith.constant 1 : index
    %c29_147 = arith.constant 29 : index
    %88 = memref.load %arg2[%c1_146, %c29_147] : memref<3x32xf32, #tpu.memory_space<smem>>
    %c2_148 = arith.constant 2 : index
    %c29_149 = arith.constant 29 : index
    %89 = memref.load %arg2[%c2_148, %c29_149] : memref<3x32xf32, #tpu.memory_space<smem>>
    %c0_150 = arith.constant 0 : index
    %c30 = arith.constant 30 : index
    %90 = memref.load %arg2[%c0_150, %c30] : memref<3x32xf32, #tpu.memory_space<smem>>
    %c1_151 = arith.constant 1 : index
    %c30_152 = arith.constant 30 : index
    %91 = memref.load %arg2[%c1_151, %c30_152] : memref<3x32xf32, #tpu.memory_space<smem>>
    %c2_153 = arith.constant 2 : index
    %c30_154 = arith.constant 30 : index
    %92 = memref.load %arg2[%c2_153, %c30_154] : memref<3x32xf32, #tpu.memory_space<smem>>
    %c0_155 = arith.constant 0 : index
    %c31 = arith.constant 31 : index
    %93 = memref.load %arg2[%c0_155, %c31] : memref<3x32xf32, #tpu.memory_space<smem>>
    %c1_156 = arith.constant 1 : index
    %c31_157 = arith.constant 31 : index
    %94 = memref.load %arg2[%c1_156, %c31_157] : memref<3x32xf32, #tpu.memory_space<smem>>
    %c2_158 = arith.constant 2 : index
    %c31_159 = arith.constant 31 : index
    %95 = memref.load %arg2[%c2_158, %c31_159] : memref<3x32xf32, #tpu.memory_space<smem>>
    %c0_160 = arith.constant 0 : index
    %96 = memref.load %arg3[%c0_160] : memref<32xf32, #tpu.memory_space<smem>>
    %c1_161 = arith.constant 1 : index
    %97 = memref.load %arg3[%c1_161] : memref<32xf32, #tpu.memory_space<smem>>
    %c2_162 = arith.constant 2 : index
    %98 = memref.load %arg3[%c2_162] : memref<32xf32, #tpu.memory_space<smem>>
    %c3_163 = arith.constant 3 : index
    %99 = memref.load %arg3[%c3_163] : memref<32xf32, #tpu.memory_space<smem>>
    %c4_164 = arith.constant 4 : index
    %100 = memref.load %arg3[%c4_164] : memref<32xf32, #tpu.memory_space<smem>>
    %c5_165 = arith.constant 5 : index
    %101 = memref.load %arg3[%c5_165] : memref<32xf32, #tpu.memory_space<smem>>
    %c6_166 = arith.constant 6 : index
    %102 = memref.load %arg3[%c6_166] : memref<32xf32, #tpu.memory_space<smem>>
    %c7_167 = arith.constant 7 : index
    %103 = memref.load %arg3[%c7_167] : memref<32xf32, #tpu.memory_space<smem>>
    %c8_168 = arith.constant 8 : index
    %104 = memref.load %arg3[%c8_168] : memref<32xf32, #tpu.memory_space<smem>>
    %c9_169 = arith.constant 9 : index
    %105 = memref.load %arg3[%c9_169] : memref<32xf32, #tpu.memory_space<smem>>
    %c10_170 = arith.constant 10 : index
    %106 = memref.load %arg3[%c10_170] : memref<32xf32, #tpu.memory_space<smem>>
    %c11_171 = arith.constant 11 : index
    %107 = memref.load %arg3[%c11_171] : memref<32xf32, #tpu.memory_space<smem>>
    %c12_172 = arith.constant 12 : index
    %108 = memref.load %arg3[%c12_172] : memref<32xf32, #tpu.memory_space<smem>>
    %c13_173 = arith.constant 13 : index
    %109 = memref.load %arg3[%c13_173] : memref<32xf32, #tpu.memory_space<smem>>
    %c14_174 = arith.constant 14 : index
    %110 = memref.load %arg3[%c14_174] : memref<32xf32, #tpu.memory_space<smem>>
    %c15_175 = arith.constant 15 : index
    %111 = memref.load %arg3[%c15_175] : memref<32xf32, #tpu.memory_space<smem>>
    %c16_176 = arith.constant 16 : index
    %112 = memref.load %arg3[%c16_176] : memref<32xf32, #tpu.memory_space<smem>>
    %c17_177 = arith.constant 17 : index
    %113 = memref.load %arg3[%c17_177] : memref<32xf32, #tpu.memory_space<smem>>
    %c18_178 = arith.constant 18 : index
    %114 = memref.load %arg3[%c18_178] : memref<32xf32, #tpu.memory_space<smem>>
    %c19_179 = arith.constant 19 : index
    %115 = memref.load %arg3[%c19_179] : memref<32xf32, #tpu.memory_space<smem>>
    %c20_180 = arith.constant 20 : index
    %116 = memref.load %arg3[%c20_180] : memref<32xf32, #tpu.memory_space<smem>>
    %c21_181 = arith.constant 21 : index
    %117 = memref.load %arg3[%c21_181] : memref<32xf32, #tpu.memory_space<smem>>
    %c22_182 = arith.constant 22 : index
    %118 = memref.load %arg3[%c22_182] : memref<32xf32, #tpu.memory_space<smem>>
    %c23_183 = arith.constant 23 : index
    %119 = memref.load %arg3[%c23_183] : memref<32xf32, #tpu.memory_space<smem>>
    %c24_184 = arith.constant 24 : index
    %120 = memref.load %arg3[%c24_184] : memref<32xf32, #tpu.memory_space<smem>>
    %c25_185 = arith.constant 25 : index
    %121 = memref.load %arg3[%c25_185] : memref<32xf32, #tpu.memory_space<smem>>
    %c26_186 = arith.constant 26 : index
    %122 = memref.load %arg3[%c26_186] : memref<32xf32, #tpu.memory_space<smem>>
    %c27_187 = arith.constant 27 : index
    %123 = memref.load %arg3[%c27_187] : memref<32xf32, #tpu.memory_space<smem>>
    %c28_188 = arith.constant 28 : index
    %124 = memref.load %arg3[%c28_188] : memref<32xf32, #tpu.memory_space<smem>>
    %c29_189 = arith.constant 29 : index
    %125 = memref.load %arg3[%c29_189] : memref<32xf32, #tpu.memory_space<smem>>
    %c30_190 = arith.constant 30 : index
    %126 = memref.load %arg3[%c30_190] : memref<32xf32, #tpu.memory_space<smem>>
    %c31_191 = arith.constant 31 : index
    %127 = memref.load %arg3[%c31_191] : memref<32xf32, #tpu.memory_space<smem>>
    %cst = arith.constant 0.000000e+00 : f32
    %128 = vector.broadcast %cst : f32 to vector<8x32xf32>
    %c0_192 = arith.constant 0 : index
    %c0_193 = arith.constant 0 : index
    %129 = vector.load %arg1[%c0_192, %c0_193] : memref<8x768xf32, #tpu.memory_space<vmem>>, vector<8x256xf32>
    %c0_194 = arith.constant 0 : index
    %c256 = arith.constant 256 : index
    %130 = vector.load %arg1[%c0_194, %c256] : memref<8x768xf32, #tpu.memory_space<vmem>>, vector<8x256xf32>
    %c0_195 = arith.constant 0 : index
    %c512 = arith.constant 512 : index
    %131 = vector.load %arg1[%c0_195, %c512] : memref<8x768xf32, #tpu.memory_space<vmem>>, vector<8x256xf32>
    %132 = vector.broadcast %0 : f32 to vector<8x256xf32>
    %133 = arith.mulf %132, %129 : vector<8x256xf32>
    %134 = vector.broadcast %1 : f32 to vector<8x256xf32>
    %135 = arith.mulf %134, %130 : vector<8x256xf32>
    %136 = arith.addf %133, %135 : vector<8x256xf32>
    %137 = vector.broadcast %2 : f32 to vector<8x256xf32>
    %138 = arith.mulf %137, %131 : vector<8x256xf32>
    %139 = arith.addf %136, %138 : vector<8x256xf32>
    %140 = vector.broadcast %96 : f32 to vector<8x256xf32>
    %141 = arith.addf %139, %140 : vector<8x256xf32>
    %cst_196 = arith.constant 0.000000e+00 : f32
    %142 = vector.broadcast %cst_196 : f32 to vector<8x256xf32>
    %143 = arith.maximumf %141, %142 : vector<8x256xf32>
    %cst_197 = arith.constant dense<0.000000e+00> : vector<8xf32>
    %144 = vector.multi_reduction <add>, %143, %cst_197 [1] : vector<8x256xf32> to vector<8xf32>
    %145 = vector.shape_cast %144 : vector<8xf32> to vector<8x1xf32>
    %146 = vector.broadcast %3 : f32 to vector<8x256xf32>
    %147 = arith.mulf %146, %129 : vector<8x256xf32>
    %148 = vector.broadcast %4 : f32 to vector<8x256xf32>
    %149 = arith.mulf %148, %130 : vector<8x256xf32>
    %150 = arith.addf %147, %149 : vector<8x256xf32>
    %151 = vector.broadcast %5 : f32 to vector<8x256xf32>
    %152 = arith.mulf %151, %131 : vector<8x256xf32>
    %153 = arith.addf %150, %152 : vector<8x256xf32>
    %154 = vector.broadcast %97 : f32 to vector<8x256xf32>
    %155 = arith.addf %153, %154 : vector<8x256xf32>
    %cst_198 = arith.constant 0.000000e+00 : f32
    %156 = vector.broadcast %cst_198 : f32 to vector<8x256xf32>
    %157 = arith.maximumf %155, %156 : vector<8x256xf32>
    %cst_199 = arith.constant dense<0.000000e+00> : vector<8xf32>
    %158 = vector.multi_reduction <add>, %157, %cst_199 [1] : vector<8x256xf32> to vector<8xf32>
    %159 = vector.shape_cast %158 : vector<8xf32> to vector<8x1xf32>
    %160 = vector.broadcast %6 : f32 to vector<8x256xf32>
    %161 = arith.mulf %160, %129 : vector<8x256xf32>
    %162 = vector.broadcast %7 : f32 to vector<8x256xf32>
    %163 = arith.mulf %162, %130 : vector<8x256xf32>
    %164 = arith.addf %161, %163 : vector<8x256xf32>
    %165 = vector.broadcast %8 : f32 to vector<8x256xf32>
    %166 = arith.mulf %165, %131 : vector<8x256xf32>
    %167 = arith.addf %164, %166 : vector<8x256xf32>
    %168 = vector.broadcast %98 : f32 to vector<8x256xf32>
    %169 = arith.addf %167, %168 : vector<8x256xf32>
    %cst_200 = arith.constant 0.000000e+00 : f32
    %170 = vector.broadcast %cst_200 : f32 to vector<8x256xf32>
    %171 = arith.maximumf %169, %170 : vector<8x256xf32>
    %cst_201 = arith.constant dense<0.000000e+00> : vector<8xf32>
    %172 = vector.multi_reduction <add>, %171, %cst_201 [1] : vector<8x256xf32> to vector<8xf32>
    %173 = vector.shape_cast %172 : vector<8xf32> to vector<8x1xf32>
    %174 = vector.broadcast %9 : f32 to vector<8x256xf32>
    %175 = arith.mulf %174, %129 : vector<8x256xf32>
    %176 = vector.broadcast %10 : f32 to vector<8x256xf32>
    %177 = arith.mulf %176, %130 : vector<8x256xf32>
    %178 = arith.addf %175, %177 : vector<8x256xf32>
    %179 = vector.broadcast %11 : f32 to vector<8x256xf32>
    %180 = arith.mulf %179, %131 : vector<8x256xf32>
    %181 = arith.addf %178, %180 : vector<8x256xf32>
    %182 = vector.broadcast %99 : f32 to vector<8x256xf32>
    %183 = arith.addf %181, %182 : vector<8x256xf32>
    %cst_202 = arith.constant 0.000000e+00 : f32
    %184 = vector.broadcast %cst_202 : f32 to vector<8x256xf32>
    %185 = arith.maximumf %183, %184 : vector<8x256xf32>
    %cst_203 = arith.constant dense<0.000000e+00> : vector<8xf32>
    %186 = vector.multi_reduction <add>, %185, %cst_203 [1] : vector<8x256xf32> to vector<8xf32>
    %187 = vector.shape_cast %186 : vector<8xf32> to vector<8x1xf32>
    %188 = vector.broadcast %12 : f32 to vector<8x256xf32>
    %189 = arith.mulf %188, %129 : vector<8x256xf32>
    %190 = vector.broadcast %13 : f32 to vector<8x256xf32>
    %191 = arith.mulf %190, %130 : vector<8x256xf32>
    %192 = arith.addf %189, %191 : vector<8x256xf32>
    %193 = vector.broadcast %14 : f32 to vector<8x256xf32>
    %194 = arith.mulf %193, %131 : vector<8x256xf32>
    %195 = arith.addf %192, %194 : vector<8x256xf32>
    %196 = vector.broadcast %100 : f32 to vector<8x256xf32>
    %197 = arith.addf %195, %196 : vector<8x256xf32>
    %cst_204 = arith.constant 0.000000e+00 : f32
    %198 = vector.broadcast %cst_204 : f32 to vector<8x256xf32>
    %199 = arith.maximumf %197, %198 : vector<8x256xf32>
    %cst_205 = arith.constant dense<0.000000e+00> : vector<8xf32>
    %200 = vector.multi_reduction <add>, %199, %cst_205 [1] : vector<8x256xf32> to vector<8xf32>
    %201 = vector.shape_cast %200 : vector<8xf32> to vector<8x1xf32>
    %202 = vector.broadcast %15 : f32 to vector<8x256xf32>
    %203 = arith.mulf %202, %129 : vector<8x256xf32>
    %204 = vector.broadcast %16 : f32 to vector<8x256xf32>
    %205 = arith.mulf %204, %130 : vector<8x256xf32>
    %206 = arith.addf %203, %205 : vector<8x256xf32>
    %207 = vector.broadcast %17 : f32 to vector<8x256xf32>
    %208 = arith.mulf %207, %131 : vector<8x256xf32>
    %209 = arith.addf %206, %208 : vector<8x256xf32>
    %210 = vector.broadcast %101 : f32 to vector<8x256xf32>
    %211 = arith.addf %209, %210 : vector<8x256xf32>
    %cst_206 = arith.constant 0.000000e+00 : f32
    %212 = vector.broadcast %cst_206 : f32 to vector<8x256xf32>
    %213 = arith.maximumf %211, %212 : vector<8x256xf32>
    %cst_207 = arith.constant dense<0.000000e+00> : vector<8xf32>
    %214 = vector.multi_reduction <add>, %213, %cst_207 [1] : vector<8x256xf32> to vector<8xf32>
    %215 = vector.shape_cast %214 : vector<8xf32> to vector<8x1xf32>
    %216 = vector.broadcast %18 : f32 to vector<8x256xf32>
    %217 = arith.mulf %216, %129 : vector<8x256xf32>
    %218 = vector.broadcast %19 : f32 to vector<8x256xf32>
    %219 = arith.mulf %218, %130 : vector<8x256xf32>
    %220 = arith.addf %217, %219 : vector<8x256xf32>
    %221 = vector.broadcast %20 : f32 to vector<8x256xf32>
    %222 = arith.mulf %221, %131 : vector<8x256xf32>
    %223 = arith.addf %220, %222 : vector<8x256xf32>
    %224 = vector.broadcast %102 : f32 to vector<8x256xf32>
    %225 = arith.addf %223, %224 : vector<8x256xf32>
    %cst_208 = arith.constant 0.000000e+00 : f32
    %226 = vector.broadcast %cst_208 : f32 to vector<8x256xf32>
    %227 = arith.maximumf %225, %226 : vector<8x256xf32>
    %cst_209 = arith.constant dense<0.000000e+00> : vector<8xf32>
    %228 = vector.multi_reduction <add>, %227, %cst_209 [1] : vector<8x256xf32> to vector<8xf32>
    %229 = vector.shape_cast %228 : vector<8xf32> to vector<8x1xf32>
    %230 = vector.broadcast %21 : f32 to vector<8x256xf32>
    %231 = arith.mulf %230, %129 : vector<8x256xf32>
    %232 = vector.broadcast %22 : f32 to vector<8x256xf32>
    %233 = arith.mulf %232, %130 : vector<8x256xf32>
    %234 = arith.addf %231, %233 : vector<8x256xf32>
    %235 = vector.broadcast %23 : f32 to vector<8x256xf32>
    %236 = arith.mulf %235, %131 : vector<8x256xf32>
    %237 = arith.addf %234, %236 : vector<8x256xf32>
    %238 = vector.broadcast %103 : f32 to vector<8x256xf32>
    %239 = arith.addf %237, %238 : vector<8x256xf32>
    %cst_210 = arith.constant 0.000000e+00 : f32
    %240 = vector.broadcast %cst_210 : f32 to vector<8x256xf32>
    %241 = arith.maximumf %239, %240 : vector<8x256xf32>
    %cst_211 = arith.constant dense<0.000000e+00> : vector<8xf32>
    %242 = vector.multi_reduction <add>, %241, %cst_211 [1] : vector<8x256xf32> to vector<8xf32>
    %243 = vector.shape_cast %242 : vector<8xf32> to vector<8x1xf32>
    %244 = vector.broadcast %24 : f32 to vector<8x256xf32>
    %245 = arith.mulf %244, %129 : vector<8x256xf32>
    %246 = vector.broadcast %25 : f32 to vector<8x256xf32>
    %247 = arith.mulf %246, %130 : vector<8x256xf32>
    %248 = arith.addf %245, %247 : vector<8x256xf32>
    %249 = vector.broadcast %26 : f32 to vector<8x256xf32>
    %250 = arith.mulf %249, %131 : vector<8x256xf32>
    %251 = arith.addf %248, %250 : vector<8x256xf32>
    %252 = vector.broadcast %104 : f32 to vector<8x256xf32>
    %253 = arith.addf %251, %252 : vector<8x256xf32>
    %cst_212 = arith.constant 0.000000e+00 : f32
    %254 = vector.broadcast %cst_212 : f32 to vector<8x256xf32>
    %255 = arith.maximumf %253, %254 : vector<8x256xf32>
    %cst_213 = arith.constant dense<0.000000e+00> : vector<8xf32>
    %256 = vector.multi_reduction <add>, %255, %cst_213 [1] : vector<8x256xf32> to vector<8xf32>
    %257 = vector.shape_cast %256 : vector<8xf32> to vector<8x1xf32>
    %258 = vector.broadcast %27 : f32 to vector<8x256xf32>
    %259 = arith.mulf %258, %129 : vector<8x256xf32>
    %260 = vector.broadcast %28 : f32 to vector<8x256xf32>
    %261 = arith.mulf %260, %130 : vector<8x256xf32>
    %262 = arith.addf %259, %261 : vector<8x256xf32>
    %263 = vector.broadcast %29 : f32 to vector<8x256xf32>
    %264 = arith.mulf %263, %131 : vector<8x256xf32>
    %265 = arith.addf %262, %264 : vector<8x256xf32>
    %266 = vector.broadcast %105 : f32 to vector<8x256xf32>
    %267 = arith.addf %265, %266 : vector<8x256xf32>
    %cst_214 = arith.constant 0.000000e+00 : f32
    %268 = vector.broadcast %cst_214 : f32 to vector<8x256xf32>
    %269 = arith.maximumf %267, %268 : vector<8x256xf32>
    %cst_215 = arith.constant dense<0.000000e+00> : vector<8xf32>
    %270 = vector.multi_reduction <add>, %269, %cst_215 [1] : vector<8x256xf32> to vector<8xf32>
    %271 = vector.shape_cast %270 : vector<8xf32> to vector<8x1xf32>
    %272 = vector.broadcast %30 : f32 to vector<8x256xf32>
    %273 = arith.mulf %272, %129 : vector<8x256xf32>
    %274 = vector.broadcast %31 : f32 to vector<8x256xf32>
    %275 = arith.mulf %274, %130 : vector<8x256xf32>
    %276 = arith.addf %273, %275 : vector<8x256xf32>
    %277 = vector.broadcast %32 : f32 to vector<8x256xf32>
    %278 = arith.mulf %277, %131 : vector<8x256xf32>
    %279 = arith.addf %276, %278 : vector<8x256xf32>
    %280 = vector.broadcast %106 : f32 to vector<8x256xf32>
    %281 = arith.addf %279, %280 : vector<8x256xf32>
    %cst_216 = arith.constant 0.000000e+00 : f32
    %282 = vector.broadcast %cst_216 : f32 to vector<8x256xf32>
    %283 = arith.maximumf %281, %282 : vector<8x256xf32>
    %cst_217 = arith.constant dense<0.000000e+00> : vector<8xf32>
    %284 = vector.multi_reduction <add>, %283, %cst_217 [1] : vector<8x256xf32> to vector<8xf32>
    %285 = vector.shape_cast %284 : vector<8xf32> to vector<8x1xf32>
    %286 = vector.broadcast %33 : f32 to vector<8x256xf32>
    %287 = arith.mulf %286, %129 : vector<8x256xf32>
    %288 = vector.broadcast %34 : f32 to vector<8x256xf32>
    %289 = arith.mulf %288, %130 : vector<8x256xf32>
    %290 = arith.addf %287, %289 : vector<8x256xf32>
    %291 = vector.broadcast %35 : f32 to vector<8x256xf32>
    %292 = arith.mulf %291, %131 : vector<8x256xf32>
    %293 = arith.addf %290, %292 : vector<8x256xf32>
    %294 = vector.broadcast %107 : f32 to vector<8x256xf32>
    %295 = arith.addf %293, %294 : vector<8x256xf32>
    %cst_218 = arith.constant 0.000000e+00 : f32
    %296 = vector.broadcast %cst_218 : f32 to vector<8x256xf32>
    %297 = arith.maximumf %295, %296 : vector<8x256xf32>
    %cst_219 = arith.constant dense<0.000000e+00> : vector<8xf32>
    %298 = vector.multi_reduction <add>, %297, %cst_219 [1] : vector<8x256xf32> to vector<8xf32>
    %299 = vector.shape_cast %298 : vector<8xf32> to vector<8x1xf32>
    %300 = vector.broadcast %36 : f32 to vector<8x256xf32>
    %301 = arith.mulf %300, %129 : vector<8x256xf32>
    %302 = vector.broadcast %37 : f32 to vector<8x256xf32>
    %303 = arith.mulf %302, %130 : vector<8x256xf32>
    %304 = arith.addf %301, %303 : vector<8x256xf32>
    %305 = vector.broadcast %38 : f32 to vector<8x256xf32>
    %306 = arith.mulf %305, %131 : vector<8x256xf32>
    %307 = arith.addf %304, %306 : vector<8x256xf32>
    %308 = vector.broadcast %108 : f32 to vector<8x256xf32>
    %309 = arith.addf %307, %308 : vector<8x256xf32>
    %cst_220 = arith.constant 0.000000e+00 : f32
    %310 = vector.broadcast %cst_220 : f32 to vector<8x256xf32>
    %311 = arith.maximumf %309, %310 : vector<8x256xf32>
    %cst_221 = arith.constant dense<0.000000e+00> : vector<8xf32>
    %312 = vector.multi_reduction <add>, %311, %cst_221 [1] : vector<8x256xf32> to vector<8xf32>
    %313 = vector.shape_cast %312 : vector<8xf32> to vector<8x1xf32>
    %314 = vector.broadcast %39 : f32 to vector<8x256xf32>
    %315 = arith.mulf %314, %129 : vector<8x256xf32>
    %316 = vector.broadcast %40 : f32 to vector<8x256xf32>
    %317 = arith.mulf %316, %130 : vector<8x256xf32>
    %318 = arith.addf %315, %317 : vector<8x256xf32>
    %319 = vector.broadcast %41 : f32 to vector<8x256xf32>
    %320 = arith.mulf %319, %131 : vector<8x256xf32>
    %321 = arith.addf %318, %320 : vector<8x256xf32>
    %322 = vector.broadcast %109 : f32 to vector<8x256xf32>
    %323 = arith.addf %321, %322 : vector<8x256xf32>
    %cst_222 = arith.constant 0.000000e+00 : f32
    %324 = vector.broadcast %cst_222 : f32 to vector<8x256xf32>
    %325 = arith.maximumf %323, %324 : vector<8x256xf32>
    %cst_223 = arith.constant dense<0.000000e+00> : vector<8xf32>
    %326 = vector.multi_reduction <add>, %325, %cst_223 [1] : vector<8x256xf32> to vector<8xf32>
    %327 = vector.shape_cast %326 : vector<8xf32> to vector<8x1xf32>
    %328 = vector.broadcast %42 : f32 to vector<8x256xf32>
    %329 = arith.mulf %328, %129 : vector<8x256xf32>
    %330 = vector.broadcast %43 : f32 to vector<8x256xf32>
    %331 = arith.mulf %330, %130 : vector<8x256xf32>
    %332 = arith.addf %329, %331 : vector<8x256xf32>
    %333 = vector.broadcast %44 : f32 to vector<8x256xf32>
    %334 = arith.mulf %333, %131 : vector<8x256xf32>
    %335 = arith.addf %332, %334 : vector<8x256xf32>
    %336 = vector.broadcast %110 : f32 to vector<8x256xf32>
    %337 = arith.addf %335, %336 : vector<8x256xf32>
    %cst_224 = arith.constant 0.000000e+00 : f32
    %338 = vector.broadcast %cst_224 : f32 to vector<8x256xf32>
    %339 = arith.maximumf %337, %338 : vector<8x256xf32>
    %cst_225 = arith.constant dense<0.000000e+00> : vector<8xf32>
    %340 = vector.multi_reduction <add>, %339, %cst_225 [1] : vector<8x256xf32> to vector<8xf32>
    %341 = vector.shape_cast %340 : vector<8xf32> to vector<8x1xf32>
    %342 = vector.broadcast %45 : f32 to vector<8x256xf32>
    %343 = arith.mulf %342, %129 : vector<8x256xf32>
    %344 = vector.broadcast %46 : f32 to vector<8x256xf32>
    %345 = arith.mulf %344, %130 : vector<8x256xf32>
    %346 = arith.addf %343, %345 : vector<8x256xf32>
    %347 = vector.broadcast %47 : f32 to vector<8x256xf32>
    %348 = arith.mulf %347, %131 : vector<8x256xf32>
    %349 = arith.addf %346, %348 : vector<8x256xf32>
    %350 = vector.broadcast %111 : f32 to vector<8x256xf32>
    %351 = arith.addf %349, %350 : vector<8x256xf32>
    %cst_226 = arith.constant 0.000000e+00 : f32
    %352 = vector.broadcast %cst_226 : f32 to vector<8x256xf32>
    %353 = arith.maximumf %351, %352 : vector<8x256xf32>
    %cst_227 = arith.constant dense<0.000000e+00> : vector<8xf32>
    %354 = vector.multi_reduction <add>, %353, %cst_227 [1] : vector<8x256xf32> to vector<8xf32>
    %355 = vector.shape_cast %354 : vector<8xf32> to vector<8x1xf32>
    %356 = vector.broadcast %48 : f32 to vector<8x256xf32>
    %357 = arith.mulf %356, %129 : vector<8x256xf32>
    %358 = vector.broadcast %49 : f32 to vector<8x256xf32>
    %359 = arith.mulf %358, %130 : vector<8x256xf32>
    %360 = arith.addf %357, %359 : vector<8x256xf32>
    %361 = vector.broadcast %50 : f32 to vector<8x256xf32>
    %362 = arith.mulf %361, %131 : vector<8x256xf32>
    %363 = arith.addf %360, %362 : vector<8x256xf32>
    %364 = vector.broadcast %112 : f32 to vector<8x256xf32>
    %365 = arith.addf %363, %364 : vector<8x256xf32>
    %cst_228 = arith.constant 0.000000e+00 : f32
    %366 = vector.broadcast %cst_228 : f32 to vector<8x256xf32>
    %367 = arith.maximumf %365, %366 : vector<8x256xf32>
    %cst_229 = arith.constant dense<0.000000e+00> : vector<8xf32>
    %368 = vector.multi_reduction <add>, %367, %cst_229 [1] : vector<8x256xf32> to vector<8xf32>
    %369 = vector.shape_cast %368 : vector<8xf32> to vector<8x1xf32>
    %370 = vector.broadcast %51 : f32 to vector<8x256xf32>
    %371 = arith.mulf %370, %129 : vector<8x256xf32>
    %372 = vector.broadcast %52 : f32 to vector<8x256xf32>
    %373 = arith.mulf %372, %130 : vector<8x256xf32>
    %374 = arith.addf %371, %373 : vector<8x256xf32>
    %375 = vector.broadcast %53 : f32 to vector<8x256xf32>
    %376 = arith.mulf %375, %131 : vector<8x256xf32>
    %377 = arith.addf %374, %376 : vector<8x256xf32>
    %378 = vector.broadcast %113 : f32 to vector<8x256xf32>
    %379 = arith.addf %377, %378 : vector<8x256xf32>
    %cst_230 = arith.constant 0.000000e+00 : f32
    %380 = vector.broadcast %cst_230 : f32 to vector<8x256xf32>
    %381 = arith.maximumf %379, %380 : vector<8x256xf32>
    %cst_231 = arith.constant dense<0.000000e+00> : vector<8xf32>
    %382 = vector.multi_reduction <add>, %381, %cst_231 [1] : vector<8x256xf32> to vector<8xf32>
    %383 = vector.shape_cast %382 : vector<8xf32> to vector<8x1xf32>
    %384 = vector.broadcast %54 : f32 to vector<8x256xf32>
    %385 = arith.mulf %384, %129 : vector<8x256xf32>
    %386 = vector.broadcast %55 : f32 to vector<8x256xf32>
    %387 = arith.mulf %386, %130 : vector<8x256xf32>
    %388 = arith.addf %385, %387 : vector<8x256xf32>
    %389 = vector.broadcast %56 : f32 to vector<8x256xf32>
    %390 = arith.mulf %389, %131 : vector<8x256xf32>
    %391 = arith.addf %388, %390 : vector<8x256xf32>
    %392 = vector.broadcast %114 : f32 to vector<8x256xf32>
    %393 = arith.addf %391, %392 : vector<8x256xf32>
    %cst_232 = arith.constant 0.000000e+00 : f32
    %394 = vector.broadcast %cst_232 : f32 to vector<8x256xf32>
    %395 = arith.maximumf %393, %394 : vector<8x256xf32>
    %cst_233 = arith.constant dense<0.000000e+00> : vector<8xf32>
    %396 = vector.multi_reduction <add>, %395, %cst_233 [1] : vector<8x256xf32> to vector<8xf32>
    %397 = vector.shape_cast %396 : vector<8xf32> to vector<8x1xf32>
    %398 = vector.broadcast %57 : f32 to vector<8x256xf32>
    %399 = arith.mulf %398, %129 : vector<8x256xf32>
    %400 = vector.broadcast %58 : f32 to vector<8x256xf32>
    %401 = arith.mulf %400, %130 : vector<8x256xf32>
    %402 = arith.addf %399, %401 : vector<8x256xf32>
    %403 = vector.broadcast %59 : f32 to vector<8x256xf32>
    %404 = arith.mulf %403, %131 : vector<8x256xf32>
    %405 = arith.addf %402, %404 : vector<8x256xf32>
    %406 = vector.broadcast %115 : f32 to vector<8x256xf32>
    %407 = arith.addf %405, %406 : vector<8x256xf32>
    %cst_234 = arith.constant 0.000000e+00 : f32
    %408 = vector.broadcast %cst_234 : f32 to vector<8x256xf32>
    %409 = arith.maximumf %407, %408 : vector<8x256xf32>
    %cst_235 = arith.constant dense<0.000000e+00> : vector<8xf32>
    %410 = vector.multi_reduction <add>, %409, %cst_235 [1] : vector<8x256xf32> to vector<8xf32>
    %411 = vector.shape_cast %410 : vector<8xf32> to vector<8x1xf32>
    %412 = vector.broadcast %60 : f32 to vector<8x256xf32>
    %413 = arith.mulf %412, %129 : vector<8x256xf32>
    %414 = vector.broadcast %61 : f32 to vector<8x256xf32>
    %415 = arith.mulf %414, %130 : vector<8x256xf32>
    %416 = arith.addf %413, %415 : vector<8x256xf32>
    %417 = vector.broadcast %62 : f32 to vector<8x256xf32>
    %418 = arith.mulf %417, %131 : vector<8x256xf32>
    %419 = arith.addf %416, %418 : vector<8x256xf32>
    %420 = vector.broadcast %116 : f32 to vector<8x256xf32>
    %421 = arith.addf %419, %420 : vector<8x256xf32>
    %cst_236 = arith.constant 0.000000e+00 : f32
    %422 = vector.broadcast %cst_236 : f32 to vector<8x256xf32>
    %423 = arith.maximumf %421, %422 : vector<8x256xf32>
    %cst_237 = arith.constant dense<0.000000e+00> : vector<8xf32>
    %424 = vector.multi_reduction <add>, %423, %cst_237 [1] : vector<8x256xf32> to vector<8xf32>
    %425 = vector.shape_cast %424 : vector<8xf32> to vector<8x1xf32>
    %426 = vector.broadcast %63 : f32 to vector<8x256xf32>
    %427 = arith.mulf %426, %129 : vector<8x256xf32>
    %428 = vector.broadcast %64 : f32 to vector<8x256xf32>
    %429 = arith.mulf %428, %130 : vector<8x256xf32>
    %430 = arith.addf %427, %429 : vector<8x256xf32>
    %431 = vector.broadcast %65 : f32 to vector<8x256xf32>
    %432 = arith.mulf %431, %131 : vector<8x256xf32>
    %433 = arith.addf %430, %432 : vector<8x256xf32>
    %434 = vector.broadcast %117 : f32 to vector<8x256xf32>
    %435 = arith.addf %433, %434 : vector<8x256xf32>
    %cst_238 = arith.constant 0.000000e+00 : f32
    %436 = vector.broadcast %cst_238 : f32 to vector<8x256xf32>
    %437 = arith.maximumf %435, %436 : vector<8x256xf32>
    %cst_239 = arith.constant dense<0.000000e+00> : vector<8xf32>
    %438 = vector.multi_reduction <add>, %437, %cst_239 [1] : vector<8x256xf32> to vector<8xf32>
    %439 = vector.shape_cast %438 : vector<8xf32> to vector<8x1xf32>
    %440 = vector.broadcast %66 : f32 to vector<8x256xf32>
    %441 = arith.mulf %440, %129 : vector<8x256xf32>
    %442 = vector.broadcast %67 : f32 to vector<8x256xf32>
    %443 = arith.mulf %442, %130 : vector<8x256xf32>
    %444 = arith.addf %441, %443 : vector<8x256xf32>
    %445 = vector.broadcast %68 : f32 to vector<8x256xf32>
    %446 = arith.mulf %445, %131 : vector<8x256xf32>
    %447 = arith.addf %444, %446 : vector<8x256xf32>
    %448 = vector.broadcast %118 : f32 to vector<8x256xf32>
    %449 = arith.addf %447, %448 : vector<8x256xf32>
    %cst_240 = arith.constant 0.000000e+00 : f32
    %450 = vector.broadcast %cst_240 : f32 to vector<8x256xf32>
    %451 = arith.maximumf %449, %450 : vector<8x256xf32>
    %cst_241 = arith.constant dense<0.000000e+00> : vector<8xf32>
    %452 = vector.multi_reduction <add>, %451, %cst_241 [1] : vector<8x256xf32> to vector<8xf32>
    %453 = vector.shape_cast %452 : vector<8xf32> to vector<8x1xf32>
    %454 = vector.broadcast %69 : f32 to vector<8x256xf32>
    %455 = arith.mulf %454, %129 : vector<8x256xf32>
    %456 = vector.broadcast %70 : f32 to vector<8x256xf32>
    %457 = arith.mulf %456, %130 : vector<8x256xf32>
    %458 = arith.addf %455, %457 : vector<8x256xf32>
    %459 = vector.broadcast %71 : f32 to vector<8x256xf32>
    %460 = arith.mulf %459, %131 : vector<8x256xf32>
    %461 = arith.addf %458, %460 : vector<8x256xf32>
    %462 = vector.broadcast %119 : f32 to vector<8x256xf32>
    %463 = arith.addf %461, %462 : vector<8x256xf32>
    %cst_242 = arith.constant 0.000000e+00 : f32
    %464 = vector.broadcast %cst_242 : f32 to vector<8x256xf32>
    %465 = arith.maximumf %463, %464 : vector<8x256xf32>
    %cst_243 = arith.constant dense<0.000000e+00> : vector<8xf32>
    %466 = vector.multi_reduction <add>, %465, %cst_243 [1] : vector<8x256xf32> to vector<8xf32>
    %467 = vector.shape_cast %466 : vector<8xf32> to vector<8x1xf32>
    %468 = vector.broadcast %72 : f32 to vector<8x256xf32>
    %469 = arith.mulf %468, %129 : vector<8x256xf32>
    %470 = vector.broadcast %73 : f32 to vector<8x256xf32>
    %471 = arith.mulf %470, %130 : vector<8x256xf32>
    %472 = arith.addf %469, %471 : vector<8x256xf32>
    %473 = vector.broadcast %74 : f32 to vector<8x256xf32>
    %474 = arith.mulf %473, %131 : vector<8x256xf32>
    %475 = arith.addf %472, %474 : vector<8x256xf32>
    %476 = vector.broadcast %120 : f32 to vector<8x256xf32>
    %477 = arith.addf %475, %476 : vector<8x256xf32>
    %cst_244 = arith.constant 0.000000e+00 : f32
    %478 = vector.broadcast %cst_244 : f32 to vector<8x256xf32>
    %479 = arith.maximumf %477, %478 : vector<8x256xf32>
    %cst_245 = arith.constant dense<0.000000e+00> : vector<8xf32>
    %480 = vector.multi_reduction <add>, %479, %cst_245 [1] : vector<8x256xf32> to vector<8xf32>
    %481 = vector.shape_cast %480 : vector<8xf32> to vector<8x1xf32>
    %482 = vector.broadcast %75 : f32 to vector<8x256xf32>
    %483 = arith.mulf %482, %129 : vector<8x256xf32>
    %484 = vector.broadcast %76 : f32 to vector<8x256xf32>
    %485 = arith.mulf %484, %130 : vector<8x256xf32>
    %486 = arith.addf %483, %485 : vector<8x256xf32>
    %487 = vector.broadcast %77 : f32 to vector<8x256xf32>
    %488 = arith.mulf %487, %131 : vector<8x256xf32>
    %489 = arith.addf %486, %488 : vector<8x256xf32>
    %490 = vector.broadcast %121 : f32 to vector<8x256xf32>
    %491 = arith.addf %489, %490 : vector<8x256xf32>
    %cst_246 = arith.constant 0.000000e+00 : f32
    %492 = vector.broadcast %cst_246 : f32 to vector<8x256xf32>
    %493 = arith.maximumf %491, %492 : vector<8x256xf32>
    %cst_247 = arith.constant dense<0.000000e+00> : vector<8xf32>
    %494 = vector.multi_reduction <add>, %493, %cst_247 [1] : vector<8x256xf32> to vector<8xf32>
    %495 = vector.shape_cast %494 : vector<8xf32> to vector<8x1xf32>
    %496 = vector.broadcast %78 : f32 to vector<8x256xf32>
    %497 = arith.mulf %496, %129 : vector<8x256xf32>
    %498 = vector.broadcast %79 : f32 to vector<8x256xf32>
    %499 = arith.mulf %498, %130 : vector<8x256xf32>
    %500 = arith.addf %497, %499 : vector<8x256xf32>
    %501 = vector.broadcast %80 : f32 to vector<8x256xf32>
    %502 = arith.mulf %501, %131 : vector<8x256xf32>
    %503 = arith.addf %500, %502 : vector<8x256xf32>
    %504 = vector.broadcast %122 : f32 to vector<8x256xf32>
    %505 = arith.addf %503, %504 : vector<8x256xf32>
    %cst_248 = arith.constant 0.000000e+00 : f32
    %506 = vector.broadcast %cst_248 : f32 to vector<8x256xf32>
    %507 = arith.maximumf %505, %506 : vector<8x256xf32>
    %cst_249 = arith.constant dense<0.000000e+00> : vector<8xf32>
    %508 = vector.multi_reduction <add>, %507, %cst_249 [1] : vector<8x256xf32> to vector<8xf32>
    %509 = vector.shape_cast %508 : vector<8xf32> to vector<8x1xf32>
    %510 = vector.broadcast %81 : f32 to vector<8x256xf32>
    %511 = arith.mulf %510, %129 : vector<8x256xf32>
    %512 = vector.broadcast %82 : f32 to vector<8x256xf32>
    %513 = arith.mulf %512, %130 : vector<8x256xf32>
    %514 = arith.addf %511, %513 : vector<8x256xf32>
    %515 = vector.broadcast %83 : f32 to vector<8x256xf32>
    %516 = arith.mulf %515, %131 : vector<8x256xf32>
    %517 = arith.addf %514, %516 : vector<8x256xf32>
    %518 = vector.broadcast %123 : f32 to vector<8x256xf32>
    %519 = arith.addf %517, %518 : vector<8x256xf32>
    %cst_250 = arith.constant 0.000000e+00 : f32
    %520 = vector.broadcast %cst_250 : f32 to vector<8x256xf32>
    %521 = arith.maximumf %519, %520 : vector<8x256xf32>
    %cst_251 = arith.constant dense<0.000000e+00> : vector<8xf32>
    %522 = vector.multi_reduction <add>, %521, %cst_251 [1] : vector<8x256xf32> to vector<8xf32>
    %523 = vector.shape_cast %522 : vector<8xf32> to vector<8x1xf32>
    %524 = vector.broadcast %84 : f32 to vector<8x256xf32>
    %525 = arith.mulf %524, %129 : vector<8x256xf32>
    %526 = vector.broadcast %85 : f32 to vector<8x256xf32>
    %527 = arith.mulf %526, %130 : vector<8x256xf32>
    %528 = arith.addf %525, %527 : vector<8x256xf32>
    %529 = vector.broadcast %86 : f32 to vector<8x256xf32>
    %530 = arith.mulf %529, %131 : vector<8x256xf32>
    %531 = arith.addf %528, %530 : vector<8x256xf32>
    %532 = vector.broadcast %124 : f32 to vector<8x256xf32>
    %533 = arith.addf %531, %532 : vector<8x256xf32>
    %cst_252 = arith.constant 0.000000e+00 : f32
    %534 = vector.broadcast %cst_252 : f32 to vector<8x256xf32>
    %535 = arith.maximumf %533, %534 : vector<8x256xf32>
    %cst_253 = arith.constant dense<0.000000e+00> : vector<8xf32>
    %536 = vector.multi_reduction <add>, %535, %cst_253 [1] : vector<8x256xf32> to vector<8xf32>
    %537 = vector.shape_cast %536 : vector<8xf32> to vector<8x1xf32>
    %538 = vector.broadcast %87 : f32 to vector<8x256xf32>
    %539 = arith.mulf %538, %129 : vector<8x256xf32>
    %540 = vector.broadcast %88 : f32 to vector<8x256xf32>
    %541 = arith.mulf %540, %130 : vector<8x256xf32>
    %542 = arith.addf %539, %541 : vector<8x256xf32>
    %543 = vector.broadcast %89 : f32 to vector<8x256xf32>
    %544 = arith.mulf %543, %131 : vector<8x256xf32>
    %545 = arith.addf %542, %544 : vector<8x256xf32>
    %546 = vector.broadcast %125 : f32 to vector<8x256xf32>
    %547 = arith.addf %545, %546 : vector<8x256xf32>
    %cst_254 = arith.constant 0.000000e+00 : f32
    %548 = vector.broadcast %cst_254 : f32 to vector<8x256xf32>
    %549 = arith.maximumf %547, %548 : vector<8x256xf32>
    %cst_255 = arith.constant dense<0.000000e+00> : vector<8xf32>
    %550 = vector.multi_reduction <add>, %549, %cst_255 [1] : vector<8x256xf32> to vector<8xf32>
    %551 = vector.shape_cast %550 : vector<8xf32> to vector<8x1xf32>
    %552 = vector.broadcast %90 : f32 to vector<8x256xf32>
    %553 = arith.mulf %552, %129 : vector<8x256xf32>
    %554 = vector.broadcast %91 : f32 to vector<8x256xf32>
    %555 = arith.mulf %554, %130 : vector<8x256xf32>
    %556 = arith.addf %553, %555 : vector<8x256xf32>
    %557 = vector.broadcast %92 : f32 to vector<8x256xf32>
    %558 = arith.mulf %557, %131 : vector<8x256xf32>
    %559 = arith.addf %556, %558 : vector<8x256xf32>
    %560 = vector.broadcast %126 : f32 to vector<8x256xf32>
    %561 = arith.addf %559, %560 : vector<8x256xf32>
    %cst_256 = arith.constant 0.000000e+00 : f32
    %562 = vector.broadcast %cst_256 : f32 to vector<8x256xf32>
    %563 = arith.maximumf %561, %562 : vector<8x256xf32>
    %cst_257 = arith.constant dense<0.000000e+00> : vector<8xf32>
    %564 = vector.multi_reduction <add>, %563, %cst_257 [1] : vector<8x256xf32> to vector<8xf32>
    %565 = vector.shape_cast %564 : vector<8xf32> to vector<8x1xf32>
    %566 = vector.broadcast %93 : f32 to vector<8x256xf32>
    %567 = arith.mulf %566, %129 : vector<8x256xf32>
    %568 = vector.broadcast %94 : f32 to vector<8x256xf32>
    %569 = arith.mulf %568, %130 : vector<8x256xf32>
    %570 = arith.addf %567, %569 : vector<8x256xf32>
    %571 = vector.broadcast %95 : f32 to vector<8x256xf32>
    %572 = arith.mulf %571, %131 : vector<8x256xf32>
    %573 = arith.addf %570, %572 : vector<8x256xf32>
    %574 = vector.broadcast %127 : f32 to vector<8x256xf32>
    %575 = arith.addf %573, %574 : vector<8x256xf32>
    %cst_258 = arith.constant 0.000000e+00 : f32
    %576 = vector.broadcast %cst_258 : f32 to vector<8x256xf32>
    %577 = arith.maximumf %575, %576 : vector<8x256xf32>
    %cst_259 = arith.constant dense<0.000000e+00> : vector<8xf32>
    %578 = vector.multi_reduction <add>, %577, %cst_259 [1] : vector<8x256xf32> to vector<8xf32>
    %579 = vector.shape_cast %578 : vector<8xf32> to vector<8x1xf32>
    %580 = tpu.concatenate %145, %159, %173, %187, %201, %215, %229, %243, %257, %271, %285, %299, %313, %327, %341, %355 in 1 : vector<8x1xf32>, vector<8x1xf32>, vector<8x1xf32>, vector<8x1xf32>, vector<8x1xf32>, vector<8x1xf32>, vector<8x1xf32>, vector<8x1xf32>, vector<8x1xf32>, vector<8x1xf32>, vector<8x1xf32>, vector<8x1xf32>, vector<8x1xf32>, vector<8x1xf32>, vector<8x1xf32>, vector<8x1xf32> -> vector<8x16xf32>
    %581 = tpu.concatenate %369, %383, %397, %411, %425, %439, %453, %467, %481, %495, %509, %523, %537, %551, %565, %579 in 1 : vector<8x1xf32>, vector<8x1xf32>, vector<8x1xf32>, vector<8x1xf32>, vector<8x1xf32>, vector<8x1xf32>, vector<8x1xf32>, vector<8x1xf32>, vector<8x1xf32>, vector<8x1xf32>, vector<8x1xf32>, vector<8x1xf32>, vector<8x1xf32>, vector<8x1xf32>, vector<8x1xf32>, vector<8x1xf32> -> vector<8x16xf32>
    %582 = tpu.concatenate %580, %581 in 1 : vector<8x16xf32>, vector<8x16xf32> -> vector<8x32xf32>
    %583 = arith.addf %128, %582 : vector<8x32xf32>
    %c0_260 = arith.constant 0 : index
    %c0_261 = arith.constant 0 : index
    %584 = vector.load %arg4[%c0_260, %c0_261] : memref<32x128xf32, #tpu.memory_space<vmem>>, vector<32x128xf32>
    %cst_262 = arith.constant dense<0.000000e+00> : vector<8x128xf32>
    %585 = tpu.matmul %583, %584, %cst_262 {dimension_numbers = #tpu.dot_dimension_numbers<[1], [0], [0], [1], [0, 0, 1, 1], [], []>} : vector<8x32xf32>, vector<32x128xf32>, vector<8x128xf32> -> vector<8x128xf32>
    %c0_263 = arith.constant 0 : index
    %c0_264 = arith.constant 0 : index
    %586 = vector.load %arg5[%c0_263, %c0_264] : memref<1x128xf32, #tpu.memory_space<vmem>>, vector<1x128xf32>
    %587 = vector.broadcast %586 : vector<1x128xf32> to vector<8x128xf32>
    %588 = arith.addf %585, %587 : vector<8x128xf32>
    %c0_265 = arith.constant 0 : index
    %c0_266 = arith.constant 0 : index
    %589 = vector.load %arg6[%c0_265, %c0_266] : memref<8x128xf32, #tpu.memory_space<vmem>>, vector<8x128xf32>
    tpu.vector_store %arg6[%c0_265, %c0_266], %588 {strides = array<i32>} : memref<8x128xf32, #tpu.memory_space<vmem>>, vector<8x128xf32>,
    return
  }
  func.func @transform_0(%arg0: i32) -> (i32, i32) {
    %c0_i32 = arith.constant 0 : i32
    %c0_i32_0 = arith.constant 0 : i32
    return %arg0, %c0_i32 : i32, i32
  }
  func.func @transform_1(%arg0: i32) -> (i32, i32) {
    %c0_i32 = arith.constant 0 : i32
    %c0_i32_0 = arith.constant 0 : i32
    %c0_i32_1 = arith.constant 0 : i32
    return %c0_i32, %c0_i32_0 : i32, i32
  }
  func.func @transform_2(%arg0: i32) -> i32 {
    %c0_i32 = arith.constant 0 : i32
    %c0_i32_0 = arith.constant 0 : i32
    return %c0_i32 : i32
  }
  func.func @transform_3(%arg0: i32) -> (i32, i32) {
    %c0_i32 = arith.constant 0 : i32
    %c0_i32_0 = arith.constant 0 : i32
    %c0_i32_1 = arith.constant 0 : i32
    return %c0_i32, %c0_i32_0 : i32, i32
  }
  func.func @transform_4(%arg0: i32) -> (i32, i32) {
    %c0_i32 = arith.constant 0 : i32
    %c0_i32_0 = arith.constant 0 : i32
    %c0_i32_1 = arith.constant 0 : i32
    return %c0_i32, %c0_i32_0 : i32, i32
  }
  func.func @transform_5(%arg0: i32) -> (i32, i32) {
    %c0_i32 = arith.constant 0 : i32
    %c0_i32_0 = arith.constant 0 : i32
    return %arg0, %c0_i32 : i32, i32
  }
}

</mosaic_0001>

<bundles_post_ra>
// kernel: tpu_custom_call.1
= control target key start
LH: loop header
LB: loop body
LE: loop exit
PB: predicated region body
PF: predicated region fallthrough
CT: control target
= control target key end

     0   :  { %10 = vsyncpa [#allocation3], 0  ;;  %s2676_s0 = inlined_call_operand.hbm [shape: f32[16,768], index: 0, kind: input, shape index: {}]   ;;  %s2677_s1 = inlined_call_operand.hbm [shape: f32[3,32], index: 1, kind: input, shape index: {}]   ;;  %s2678_s2 = inlined_call_operand.vmem [shape: f32[32], index: 2, kind: input, shape index: {}]   ;;  %s2679_s3 = inlined_call_operand.hbm [shape: f32[32,128], index: 3, kind: input, shape index: {}]   ;;  %s2680_s4 = inlined_call_operand.vmem [shape: f32[1,128], index: 4, kind: input, shape index: {}]   ;;  %s2681_s5 = inlined_call_operand.hbm [shape: f32[16,128], index: 5, kind: output, shape index: {}]  }
   0x1   :  { %12 = vsyncpa [#allocation3 + $0x1], 0 }
   0x2   :  { %13 = vsyncpa [#allocation5], 0 }
   0x3   :  { %14 = vsyncpa [#allocation6], 0 }
   0x4   :  { %15 = vsyncpa [#allocation10], 0 }
   0x5   :  { %16 = vsyncpa [#allocation4], 0 }
   0x6   :  { %18 = vsyncpa [#allocation4 + $0x1], 0  ;;  %s1808_s18 = smov 0   ;;  %s1810_s19 = smov 0  }
   0x7   :  { %s1812_s20 = smov 0   ;;  %s1814_s21 = smov 0  }
   0x8 LB: > { %s1829_s22 = sadd.s32 4294967295, %s1765_s21   ;;  %s1343_s23 = sadd.s32 4294967294, %s1765_s21   ;;  %s1765_s21 = sphi %s1814_s21, %s2705_s21   ;;  %s1761_s20 = sphi %s1812_s20, %s2704_s20   ;;  %s1757_s19 = sphi %s1810_s19, %s2703_s19   ;;  %s1753_s18 = sphi %s1808_s18, %s2702_s18  }
   0x9   : > { %p44_p0 = scmp.ne.s32.totalorder %s1757_s19, %s1753_s18  ;;  %p2682_p1 = scmp.eq.s32.totalorder %s1829_s22, 0 }
   0xa   : > { %p158_p3 = scmp.eq.s32.totalorder %s1343_s23, 1  ;;  %p1344_p5 = scmp.ge.s32.totalorder %s1765_s21, 1 }
   0xb   : > { %p1838_p4 = por %p2682_p1, %p44_p0  ;;  %p165_p7 = scmp.lt.s32.totalorder %s1765_s21, 3 }
   0xc   : > { %p1843_p6 = por %p158_p3, %p44_p0  ;;  %s187_s29 = sshll.u32 %s2678_s2, 4  ;;  %s188_s29 = int_to_ptr.vmem [resolvable:$true] %s187_s29 }
   0xd   : > { %s2685_s24 = scalar_select %p1838_p4, 1, 0 }
   0xe   : > { %s2686_s25 = scalar_select %p1843_p6, 1, 0 }
   0xf   : > { %p1848_p8 = pnand %p1344_p5, %p165_p7  ;;  %s1767_s6 = smov [#allocation9]  }
  0x10   : > { %s197_s7 = sshll.u32 %s1767_s6, 4  ;;  %s1601_s10 = scalar_lea.hbm %s2677_s1, 64  ;;  %s1864_s7 = int_to_ptr.vmem [resolvable:$true] %s197_s7 }
  0x11   : > { %p1528_p10 = pneg %p1848_p8  ;;  %p1602_p12 = scmp.ne.s32.totalorder %s2677_s1, %s1601_s10 }
  0x12   : > { %p1608_p5 = scmp.lt.u32.totalorder %s1601_s10, %s2677_s1 }
  0x13   : > { %p1860_p11 = pnand %p1528_p10, %p2682_p1 }
  0x15   : > { %p1603_p13 = pneg %p1860_p11 }
  0x17   : > { %p1604_p0 = pnand %p1603_p13, %p1602_p12 }
  0x19   : > { %p1605_p3 = pneg %p1604_p0 }
  0x1b   : > { %p1610_p7 = pnand %p1608_p5, %p1605_p3 }
  0x1d   : > { %1613 = shalt.err (!%p1610_p7)
}
  0x1e   : > { %s1768_s15 = smov [#allocation7]   ;;  %s1614_s23 = scalar_lea.vmem %s188_s29, 16 }
  0x1f   : > { %1531 = dma.hbm_to_smem (!%p1860_p11), %s2677_s1, 64, %s1768_s15, [#allocation5]  }
  0x20   : > { %p1615_p10 = scmp.ne.s32.totalorder %s188_s29, %s1614_s23  ;;  %p1622_p9 = scmp.lt.s32.totalorder %s188_s29, %s188_s29 }
  0x21   : > { %p1623_p1 = scmp.lt.s32.totalorder %s1614_s23, %s1614_s23 }
  0x22   : > { %p1617_p12 = pnand %p1615_p10, %p1603_p13 }
  0x23   : > { %p1624_p2 = por %p1623_p1, %p1622_p9 }
  0x24   : > { %p1618_p0 = pneg %p1617_p12 }
  0x26   : > { %p1625_p6 = pnand %p1624_p2, %p1618_p0 }
  0x28   : > { %1628 = shalt.err (!%p1625_p6)
}
  0x29   : > { %s1769_s27 = smov [#allocation8]   ;;  %s1629_s8 = scalar_lea.hbm %s2679_s3, 512 }
  0x2a   : > { %1534 = dma.vmem_to_smem (!%p1860_p11), %s188_s29, 16, %s1769_s27, [#allocation6]  }
  0x2b   : > { %p1630_p3 = scmp.ne.s32.totalorder %s2679_s3, %s1629_s8  ;;  %p1636_p1 = scmp.lt.u32.totalorder %s1629_s8, %s2679_s3 }
  0x2d   : > { %p1632_p5 = pnand %p1630_p3, %p1603_p13 }
  0x2f   : > { %p1633_p7 = pneg %p1632_p5 }
  0x31   : > { %p1638_p2 = pnand %p1636_p1, %p1633_p7 }
  0x33   : > { %1641 = shalt.err (!%p1638_p2)
}
  0x34   : > { %s1642_s29 = scalar_lea.vmem %s1864_s7, 512  ;;  %p1650_p12 = scmp.lt.s32.totalorder %s1864_s7, %s1864_s7 }
  0x35   : > { %p1643_p6 = scmp.ne.s32.totalorder %s1864_s7, %s1642_s29  ;;  %p1651_p0 = scmp.lt.s32.totalorder %s1642_s29, %s1642_s29 }
  0x37   : > { %p1645_p9 = pnand %p1643_p6, %p1603_p13  ;;  %p1652_p3 = por %p1651_p0, %p1650_p12 }
  0x39   : > { %p1646_p10 = pneg %p1645_p9 }
  0x3b   : > { %p1653_p5 = pnand %p1652_p3, %p1646_p10 }
  0x3d   : > { %1656 = shalt.err (!%p1653_p5)
}
  0x3e   : > { %s1770_s13 = smov 128   ;;  %s1771_s14 = smov 8  }
  0x3f   : > { %1537 = dma.hbm_to_vmem [thread:$0]  (!%p1860_p11), %s2679_s3, 512, %s1864_s7, [#allocation10], %s1770_s13, %s1770_s13, %s1771_s14  }
  0x40   : > { %s1916_s17 = sadd.s32 1, %s1765_s21   ;;  %s31_s27 = sadd.s32 1, %s1761_s20 }
  0x41   : > { %s28_s23 = ssub.s32 %s1765_s21, %s1916_s17  ;;  %p38_p7 = scmp.ne.s32.totalorder %s1761_s20, %s1757_s19 }
  0x42   : > { %p29_p13 = scmp.eq.s32.totalorder %s28_s23, 0  ;;  %p39_p1 = scmp.eq.s32.totalorder %s1765_s21, 0 }
  0x43   : > { %p1549_p2 = scmp.lt.s32.totalorder %s1765_s21, 2  ;;  %p2689_p9 = scmp.eq.s32.totalorder %s1829_s22, 1 }
  0x44   : > { %s1926_s28 = scalar_select %p29_p13, %s1761_s20, %s31_s27  }
  0x45   : > { %p40_p6 = por %p39_p1, %p38_p7  ;;  %p1930_p10 = por %p2689_p9, %p38_p7 }
  0x46   : > { %s214_s30 = sand.u32 1, %s1761_s20   ;;  %s1510_s8 = smul.u32 768, %s1765_s21 }
  0x47   : > { %s2690_s6 = scalar_select %p1930_p10, 1, 0 }
  0x48   : > { %s1509_s7 = smul.u32 48, %s214_s30  ;;  %p1936_p11 = pnand %p1549_p2, %p40_p6 }
  0x49   : > { %s1943_s12 = scalar_lea.hbm %s2676_s0, %s1510_s8  ;;  %s215_s14 = scalar_lea.sflag [#allocation3], %s214_s30 }
  0x4a   : > { %s218_s29 = scalar_lea.vmem [#allocation2], %s1509_s7  ;;  %s1657_s15 = scalar_lea.hbm %s1943_s12, 768 }
  0x4b   : > { %s226_s13 = sshll.u32 %s218_s29, 4  ;;  %p1658_p12 = scmp.ne.s32.totalorder %s1943_s12, %s1657_s15  ;;  %s1945_s13 = int_to_ptr.vmem [resolvable:$true] %s226_s13 }
  0x4c   : > { %p1659_p0 = pneg %p1936_p11  ;;  %s1662_s27 = scalar_lea.hbm %s2676_s0, 1536 }
  0x4d   : > { %p1663_p13 = scmp.lt.u32.totalorder %s1943_s12, %s2676_s0  ;;  %p1664_p7 = scmp.lt.u32.totalorder %s1662_s27, %s1657_s15 }
  0x4e   : > { %p1660_p3 = pnand %p1659_p0, %p1658_p12  ;;  %p1666_p2 = scmp.lt.u32.totalorder %s1657_s15, %s1943_s12 }
  0x4f   : > { %p1665_p1 = por %p1664_p7, %p1663_p13 }
  0x50   : > { %p1661_p5 = pneg %p1660_p3 }
  0x51   : > { %p1667_p6 = por %p1666_p2, %p1665_p1 }
  0x53   : > { %p1668_p9 = pnand %p1667_p6, %p1661_p5 }
  0x55   : > { %1671 = shalt.err (!%p1668_p9)
}
  0x56   : > { %s1672_s30 = scalar_lea.vmem %s1945_s13, 768  ;;  %s1772_s7 = smov [#allocation2]  }
  0x57   : > { %p1673_p12 = scmp.ne.s32.totalorder %s1945_s13, %s1672_s30  ;;  %s1677_s11 = sshll.u32 %s1772_s7, 4  ;;  %s1678_s11 = int_to_ptr.vmem [resolvable:$false] %s1677_s11 }
  0x58   : > { %s1679_s29 = scalar_lea.vmem %s1678_s11, 1536  ;;  %p1680_p4 = scmp.lt.s32.totalorder %s1945_s13, %s1678_s11 }
  0x59   : > { %p1675_p3 = pnand %p1673_p12, %p1659_p0  ;;  %p1681_p13 = scmp.lt.s32.totalorder %s1679_s29, %s1672_s30 }
  0x5b   : > { %p1676_p10 = pneg %p1675_p3  ;;  %p1682_p7 = por %p1681_p13, %p1680_p4 }
  0x5d   : > { %p1683_p1 = pnand %p1682_p7, %p1676_p10 }
  0x5f   : > { %1686 = shalt.err (!%p1683_p1)
}
  0x60   : > { %1541 = dma.hbm_to_vmem [thread:$0]  (!%p1936_p11), %s1943_s12, 768, %s1945_s13, %s215_s14  }
  0x61   : > { %235 = sbr.rel (%p1848_p8) target bundleno = 693 (0x2b5), region = 40  ;;  %s1975_s15 = sand.u32 (!%p1848_p8), 1, %s1757_s19  }
  0x62   : > { %s1511_s16 = smul.u32 (!%p1848_p8), 48, %s1975_s15  ;;  %s238_s23 = scalar_lea.sflag (!%p1848_p8), [#allocation3], %s1975_s15 }
  0x63   : > { %p2692_p4 = scmp.ne.s32.totalorder (!%p1848_p8), %s2685_s24, 0 }
  0x64   : > { %s1979_s27 = scalar_lea.vmem (!%p1848_p8), [#allocation2], %s1511_s16 }
  0x68   : > { %1732 = dma.done.wait (%p2692_p4), %s238_s23, 768  }
  0x69   : > { %1734 = vsyncadd (%p2692_p4), %s238_s23, 4294966528  ;;  %p2693_p10 = scmp.eq.s32.totalorder %s1829_s22, 0 }
  0x6b   : > { %1736 = dma.done.wait (%p2693_p10), [#allocation5], 64   ;;  %p2694_p8 = pmov %p2693_p10 }
  0x6d   : > { %1738 = vsyncadd (%p2694_p8), [#allocation5], 4294967232  ;;  %p2695_p11 = pmov %p2694_p8 }
  0x6e   : > { %p2696_p0 = pmov %p2694_p8 }
  0x6f   : > { %1740 = dma.done.wait (%p2695_p11), [#allocation6], 16  }
  0x70   : > { %1742 = vsyncadd (%p2696_p0), [#allocation6], 4294967280  ;;  %p2697_p5 = pmov %p2696_p0 }
  0x71   : > { %p2698_p2 = pmov %p2696_p0 }
  0x72   : > { %1744 = dma.done.wait (%p2697_p5), [#allocation10], 512  }
  0x73   : > { %1746 = vsyncadd (%p2698_p2), [#allocation10], 4294966784 }
  0x74   : > { %258 = sfence }
  0x75   : > { %s1402_s24 = sld [smem:[#allocation7 + $0x10]]  ;;  %s1408_s13 = sld [smem:[#allocation7 + $0x12]]  ;;  %v2000_v0 = vld [vmem:[%s1979_s27] sm:$0xff]  ;;  %v2007_v1 = vld [vmem:[%s1979_s27 + $0x8] sm:$0xff]  ;;  %v2010_v2 = vld [vmem:[%s1979_s27 + $0x10] sm:$0xff]  ;;  %vm1087_vm0 = vcmask 7168  }
  0x76   : > { %s1403_s26 = sld [smem:[#allocation7 + $0x90]]  ;;  %s1409_s14 = sld [smem:[#allocation7 + $0x92]]  ;;  %v2013_v3 = vld [vmem:[%s1979_s27 + $0x18] sm:$0xff]  ;;  %v2020_v4 = vld [vmem:[%s1979_s27 + $0x20] sm:$0xff]  ;;  %v2023_v5 = vld [vmem:[%s1979_s27 + $0x28] sm:$0xff]  ;;  %vm1089_vm1 = vcmask 15360  }
  0x77   : > { %s1404_s9 = sld [smem:[#allocation7 + $0x110]]  ;;  %s2002_s8 = sld [smem:[#allocation7 + $0x112]]  ;;  %vm1091_vm2 = vcmask 23552   ;;  %vm1093_vm3 = vcmask 31744   ;;  %vm1095_vm4 = vcmask 39936   ;;  %vm1097_vm5 = vcmask 48128  }
  0x78   : > { %s1997_s12 = sld [smem:[#allocation8 + $0x10]]  ;;  %s2004_s10 = sld [smem:[#allocation8 + $0x12]]  ;;  %vm1099_vm6 = vcmask 56320   ;;  %vm1101_vm7 = vcmask 64512   ;;  %vm1103_vm8 = vcmask 72704   ;;  %vm1105_vm9 = vcmask 80896  }
  0x79   : > { %s2015_s30 = sld [smem:[#allocation7 + $0x11]]  ;;  %s2040_s16 = sld [smem:[#allocation7 + $0x13]]  ;;  %vm1774_vm10 = vmmov 0   ;;  %vm1107_vm11 = vcmask 89088   ;;  %vm1109_vm12 = vcmask 97280   ;;  %vm1111_vm13 = vcmask 105472  }
  0x7a   : > { %s2017_s7 = sld [smem:[#allocation7 + $0x91]]  ;;  %s2044_s23 = sld [smem:[#allocation7 + $0x93]]  ;;  %vm1113_vm14 = vcmask 113664   ;;  %vm1115_vm15 = vcmask 121856  }
  0x7b   : > { %v751_v6 = vstv %s1402_s24  ;;  %v793_v14 = vstv %s1408_s13  ;;  %s2030_s11 = sld [smem:[#allocation7 + $0x111]]  ;;  %s2048_s24 = sld [smem:[#allocation7 + $0x113]] }
  0x7c   : > { %v754_v7 = vstv %s1403_s26  ;;  %v752_v8 = vmul.f32 %v751_v6, %v2000_v0  ;;  %v753_v9 = vmul.f32 %v751_v6, %v2007_v1  ;;  %v796_v15 = vstv %s1409_s14  ;;  %s2032_s29 = sld [smem:[#allocation8 + $0x11]]  ;;  %s2052_s26 = sld [smem:[#allocation8 + $0x13]] }
  0x7d   : > { %v755_v10 = vmul.f32 %v754_v7, %v2010_v2  ;;  %v756_v11 = vmul.f32 %v754_v7, %v2013_v3  ;;  %v759_v12 = vstv %s1404_s9  ;;  %v794_v20 = vmul.f32 %v793_v14, %v2000_v0  ;;  %s2054_s9 = sld [smem:[#allocation7 + $0x14]]  ;;  %p2699_p9 = scmp.ne.s32.totalorder %s2690_s6, 0 }
  0x7e   : > { %v764_v13 = vstv %s1997_s12  ;;  %v760_v18 = vmul.f32 %v759_v12, %v2020_v4  ;;  %v761_v19 = vmul.f32 %v759_v12, %v2023_v5  ;;  %v795_v21 = vmul.f32 %v793_v14, %v2007_v1  ;;  %s2062_s12 = sld [smem:[#allocation7 + $0x94]] }
  0x7f   : > { %v757_v16 = vadd.f32 %v755_v10, %v752_v8  ;;  %v758_v17 = vadd.f32 %v756_v11, %v753_v9  ;;  %v797_v22 = vmul.f32 %v796_v15, %v2010_v2  ;;  %v798_v23 = vmul.f32 %v796_v15, %v2013_v3  ;;  %s2064_s13 = sld [smem:[#allocation7 + $0x114]] }
  0x80   : > { %v801_v26 = vstv %s2002_s8  ;;  %v806_v27 = vstv %s2004_s10  ;;  %v772_v34 = vstv %s2015_s30  ;;  %v775_v35 = vstv %s2017_s7  ;;  %s2069_s14 = sld [smem:[#allocation8 + $0x14]]  ;;  %s2074_s8 = sld [smem:[#allocation7 + $0x15]] }
  0x81   : > { %v762_v24 = vadd.f32 %v760_v18, %v757_v16  ;;  %v763_v25 = vadd.f32 %v761_v19, %v758_v17  ;;  %v799_v28 = vadd.f32 %v797_v22, %v794_v20  ;;  %v800_v29 = vadd.f32 %v798_v23, %v795_v21  ;;  %s2078_s10 = sld [smem:[#allocation7 + $0x95]] }
  0x82   : > { %v802_v30 = vmul.f32 %v801_v26, %v2020_v4  ;;  %v803_v31 = vmul.f32 %v801_v26, %v2023_v5  ;;  %v773_v38 = vmul.f32 %v772_v34, %v2000_v0  ;;  %v774_v39 = vmul.f32 %v772_v34, %v2007_v1  ;;  %s2083_s30 = sld [smem:[#allocation7 + $0x115]] }
  0x83   : > { %v765_v32 = vadd.f32 %v764_v13, %v762_v24  ;;  %v766_v33 = vadd.f32 %v764_v13, %v763_v25  ;;  %v776_v42 = vmul.f32 %v775_v35, %v2010_v2  ;;  %v777_v43 = vmul.f32 %v775_v35, %v2013_v3  ;;  %s2086_s7 = sld [smem:[#allocation8 + $0x15]] }
  0x84   : > { %v804_v36 = vadd.f32 %v802_v30, %v799_v28  ;;  %v805_v37 = vadd.f32 %v803_v31, %v800_v29  ;;  %v780_v46 = vstv %s2030_s11  ;;  %v785_v47 = vstv %s2032_s29  ;;  %s2088_s11 = sld [smem:[#allocation7 + $0x16]] }
  0x85   : > { %v767_v40 = vmax.f32 %v765_v32, 0.0  ;;  %v768_v41 = vmax.f32 %v766_v33, 0.0  ;;  %v778_v49 = vadd.f32 %v776_v42, %v773_v38  ;;  %v779_v50 = vadd.f32 %v777_v43, %v774_v39  ;;  %s2098_s29 = sld [smem:[#allocation7 + $0x96]] }
  0x86   : > { %v807_v44 = vadd.f32 %v806_v27, %v804_v36  ;;  %v808_v45 = vadd.f32 %v806_v27, %v805_v37  ;;  %v781_v51 = vmul.f32 %v780_v46, %v2020_v4  ;;  %v782_v54 = vmul.f32 %v780_v46, %v2023_v5 }
  0x87   : > { %v769_v48 = vadd.f32 %v768_v41, %v767_v40  ;;  %v814_v55 = vstv %s2040_s16  ;;  %v817_v59 = vstv %s2044_s23  ;;  %v822_v7 = vstv %s2048_s24  ;;  %s2102_s16 = sld [smem:[#allocation7 + $0x116]]  ;;  %s2107_s24 = sld [smem:[#allocation7 + $0x17]] }
  0x88   : > { %v809_v52 = vmax.f32 %v807_v44, 0.0  ;;  %v810_v53 = vmax.f32 %v808_v45, 0.0  ;;  %v783_v56 = vadd.f32 %v781_v51, %v778_v49  ;;  %v815_v57 = vmul.f32 %v814_v55, %v2000_v0  ;;  %s2105_s23 = sld [smem:[#allocation8 + $0x16]] }
  0x89   : > { %770 = vadd.xlane.f32.xlu0 %v769_v48  ;;  %v816_v58 = vmul.f32 %v814_v55, %v2007_v1  ;;  %v784_v61 = vadd.f32 %v782_v54, %v779_v50  ;;  %v818_v62 = vmul.f32 %v817_v59, %v2010_v2  ;;  %v819_v63 = vmul.f32 %v817_v59, %v2013_v3 }
  0x8a   : > { %v811_v60 = vadd.f32 %v810_v53, %v809_v52  ;;  %v786_v6 = vadd.f32 %v785_v47, %v783_v56  ;;  %v827_v8 = vstv %s2052_s26  ;;  %v835_v9 = vstv %s2054_s9  ;;  %s2117_s26 = sld [smem:[#allocation7 + $0x97]] }
  0x8b   : > { %v787_v10 = vadd.f32 %v785_v47, %v784_v61  ;;  %v820_v11 = vadd.f32 %v818_v62, %v815_v57  ;;  %v821_v12 = vadd.f32 %v819_v63, %v816_v58  ;;  %v823_v13 = vmul.f32 %v822_v7, %v2020_v4  ;;  %s2119_s9 = sld [smem:[#allocation7 + $0x117]] }
  0x8c   : > { %812 = vadd.xlane.f32.xlu1 %v811_v60  ;;  %v788_v14 = vmax.f32 %v786_v6, 0.0  ;;  %v824_v15 = vmul.f32 %v822_v7, %v2023_v5  ;;  %v836_v16 = vmul.f32 %v835_v9, %v2000_v0  ;;  %v837_v17 = vmul.f32 %v835_v9, %v2007_v1 }
  0x8d   : > { %v789_v18 = vmax.f32 %v787_v10, 0.0  ;;  %v825_v19 = vadd.f32 %v823_v13, %v820_v11  ;;  %v838_v20 = vstv %s2062_s12  ;;  %v843_v21 = vstv %s2064_s13  ;;  %s2124_s12 = sld [smem:[#allocation8 + $0x17]]  ;;  %s2128_s13 = sld [smem:[#allocation7 + $0x18]] }
  0x8e   : > { %v826_v22 = vadd.f32 %v824_v15, %v821_v12  ;;  %v839_v23 = vmul.f32 %v838_v20, %v2010_v2  ;;  %v840_v24 = vmul.f32 %v838_v20, %v2013_v3  ;;  %v844_v25 = vmul.f32 %v843_v21, %v2020_v4 }
  0x8f   : > { %v790_v26 = vadd.f32 %v789_v18, %v788_v14  ;;  %v828_v27 = vadd.f32 %v827_v8, %v825_v19  ;;  %v845_v28 = vmul.f32 %v843_v21, %v2023_v5  ;;  %v848_v29 = vstv %s2069_s14  ;;  %s2130_s14 = sld [smem:[#allocation7 + $0x98]] }
  0x90   : > { %v829_v30 = vadd.f32 %v827_v8, %v826_v22  ;;  %v841_v31 = vadd.f32 %v839_v23, %v836_v16  ;;  %v842_v32 = vadd.f32 %v840_v24, %v837_v17  ;;  %v856_v33 = vstv %s2074_s8  ;;  %s2134_s8 = sld [smem:[#allocation7 + $0x118]] }
  0x91   : > { %791 = vadd.xlane.f32.xlu0 %v790_v26  ;;  %v830_v34 = vmax.f32 %v828_v27, 0.0  ;;  %v857_v35 = vmul.f32 %v856_v33, %v2000_v0  ;;  %v858_v36 = vmul.f32 %v856_v33, %v2007_v1  ;;  %v859_v37 = vstv %s2078_s10  ;;  %s2136_s10 = sld [smem:[#allocation8 + $0x18]] }
  0x92   : > { %v831_v38 = vmax.f32 %v829_v30, 0.0  ;;  %v846_v39 = vadd.f32 %v844_v25, %v841_v31  ;;  %v847_v40 = vadd.f32 %v845_v28, %v842_v32  ;;  %v860_v41 = vmul.f32 %v859_v37, %v2010_v2 }
  0x93   : > { %v861_v42 = vmul.f32 %v859_v37, %v2013_v3  ;;  %v864_v43 = vstv %s2083_s30  ;;  %v869_v44 = vstv %s2086_s7  ;;  %v877_v45 = vstv %s2088_s11  ;;  %s2147_s30 = sld [smem:[#allocation7 + $0x19]] }
  0x94   : > { %v832_v46 = vadd.f32 %v831_v38, %v830_v34  ;;  %v849_v47 = vadd.f32 %v848_v29, %v846_v39  ;;  %v850_v48 = vadd.f32 %v848_v29, %v847_v40  ;;  %v862_v49 = vadd.f32 %v860_v41, %v857_v35  ;;  %s2154_s7 = sld [smem:[#allocation7 + $0x99]] }
  0x95   : > { %v863_v50 = vadd.f32 %v861_v42, %v858_v36  ;;  %v865_v51 = vmul.f32 %v864_v43, %v2020_v4  ;;  %v866_v52 = vmul.f32 %v864_v43, %v2023_v5  ;;  %v878_v53 = vmul.f32 %v877_v45, %v2000_v0  ;;  %s2156_s11 = sld [smem:[#allocation7 + $0x119]] }
  0x96   : > { %833 = vadd.xlane.f32.xlu1 %v832_v46  ;;  %v851_v54 = vmax.f32 %v849_v47, 0.0  ;;  %v852_v55 = vmax.f32 %v850_v48, 0.0  ;;  %v879_v56 = vmul.f32 %v877_v45, %v2007_v1  ;;  %v880_v57 = vstv %s2098_s29  ;;  %s2162_s29 = sld [smem:[#allocation8 + $0x19]] }
  0x97   : > { %v867_v58 = vadd.f32 %v865_v51, %v862_v49  ;;  %v868_v59 = vadd.f32 %v866_v52, %v863_v50  ;;  %v881_v60 = vmul.f32 %v880_v57, %v2010_v2  ;;  %v882_v61 = vmul.f32 %v880_v57, %v2013_v3 }
  0x98   : > { %v853_v62 = vadd.f32 %v852_v55, %v851_v54  ;;  %v885_v63 = vstv %s2102_s16  ;;  %v890_v6 = vstv %s2105_s23  ;;  %v898_v7 = vstv %s2107_s24  ;;  %s2164_s16 = sld [smem:[#allocation7 + $0x1a]] }
  0x99   : > { %v870_v8 = vadd.f32 %v869_v44, %v867_v58  ;;  %v871_v9 = vadd.f32 %v869_v44, %v868_v59  ;;  %v883_v10 = vadd.f32 %v881_v60, %v878_v53  ;;  %v884_v11 = vadd.f32 %v882_v61, %v879_v56  ;;  %s2166_s23 = sld [smem:[#allocation7 + $0x9a]] }
  0x9a   : > { %854 = vadd.xlane.f32.xlu0 %v853_v62  ;;  %v886_v12 = vmul.f32 %v885_v63, %v2020_v4  ;;  %v887_v13 = vmul.f32 %v885_v63, %v2023_v5  ;;  %v899_v14 = vmul.f32 %v898_v7, %v2000_v0  ;;  %v900_v15 = vmul.f32 %v898_v7, %v2007_v1  ;;  %s2173_s24 = sld [smem:[#allocation7 + $0x11a]] }
  0x9b   : > { %v872_v16 = vmax.f32 %v870_v8, 0.0  ;;  %v873_v17 = vmax.f32 %v871_v9, 0.0  ;;  %v901_v18 = vstv %s2117_s26  ;;  %v906_v19 = vstv %s2119_s9  ;;  %s2177_s26 = sld [smem:[#allocation8 + $0x1a]]  ;;  %s2179_s9 = sld [smem:[#allocation7 + $0x1b]] }
  0x9c   : > { %v888_v20 = vadd.f32 %v886_v12, %v883_v10  ;;  %v889_v21 = vadd.f32 %v887_v13, %v884_v11  ;;  %v902_v22 = vmul.f32 %v901_v18, %v2010_v2  ;;  %v903_v23 = vmul.f32 %v901_v18, %v2013_v3 }
  0x9d   : > { %v874_v24 = vadd.f32 %v873_v17, %v872_v16  ;;  %v907_v25 = vmul.f32 %v906_v19, %v2020_v4  ;;  %v908_v26 = vmul.f32 %v906_v19, %v2023_v5  ;;  %v911_v27 = vstv %s2124_s12  ;;  %s2188_s12 = sld [smem:[#allocation7 + $0x9b]] }
  0x9e   : > { %v891_v28 = vadd.f32 %v890_v6, %v888_v20  ;;  %v892_v29 = vadd.f32 %v890_v6, %v889_v21  ;;  %v904_v30 = vadd.f32 %v902_v22, %v899_v14  ;;  %v905_v31 = vadd.f32 %v903_v23, %v900_v15 }
  0x9f   : > { %875 = vadd.xlane.f32.xlu1 %v874_v24  ;;  %v919_v32 = vstv %s2128_s13  ;;  %v922_v33 = vstv %s2130_s14  ;;  %v927_v34 = vstv %s2134_s8  ;;  %v932_v35 = vstv %s2136_s10  ;;  %s2190_s13 = sld [smem:[#allocation7 + $0x11b]]  ;;  %s2200_s8 = sld [smem:[#allocation7 + $0x1c]] }
  0xa0   : > { %v893_v36 = vmax.f32 %v891_v28, 0.0  ;;  %v894_v37 = vmax.f32 %v892_v29, 0.0  ;;  %v909_v38 = vadd.f32 %v907_v25, %v904_v30  ;;  %v910_v39 = vadd.f32 %v908_v26, %v905_v31  ;;  %s2196_s14 = sld [smem:[#allocation8 + $0x1b]]  ;;  %s2202_s10 = sld [smem:[#allocation7 + $0x9c]] }
  0xa1   : > { %v920_v40 = vmul.f32 %v919_v32, %v2000_v0  ;;  %v921_v41 = vmul.f32 %v919_v32, %v2007_v1  ;;  %v923_v42 = vmul.f32 %v922_v33, %v2010_v2  ;;  %v924_v43 = vmul.f32 %v922_v33, %v2013_v3 }
  0xa2   : > { %v895_v44 = vadd.f32 %v894_v37, %v893_v36  ;;  %v912_v45 = vadd.f32 %v911_v27, %v909_v38  ;;  %v913_v46 = vadd.f32 %v911_v27, %v910_v39  ;;  %v928_v47 = vmul.f32 %v927_v34, %v2020_v4 }
  0xa3   : > { %v925_v48 = vadd.f32 %v923_v42, %v920_v40  ;;  %v926_v49 = vadd.f32 %v924_v43, %v921_v41  ;;  %v929_v50 = vmul.f32 %v927_v34, %v2023_v5  ;;  %v940_v51 = vstv %s2147_s30  ;;  %s2206_s30 = sld [smem:[#allocation7 + $0x11c]] }
  0xa4   : > { %896 = vadd.xlane.f32.xlu0 %v895_v44  ;;  %v914_v52 = vmax.f32 %v912_v45, 0.0  ;;  %v915_v53 = vmax.f32 %v913_v46, 0.0  ;;  %v941_v54 = vmul.f32 %v940_v51, %v2000_v0  ;;  %v942_v55 = vmul.f32 %v940_v51, %v2007_v1 }
  0xa5   : > { %v930_v56 = vadd.f32 %v928_v47, %v925_v48  ;;  %v931_v57 = vadd.f32 %v929_v50, %v926_v49  ;;  %v943_v58 = vstv %s2154_s7  ;;  %v948_v59 = vstv %s2156_s11  ;;  %s2208_s7 = sld [smem:[#allocation8 + $0x1c]]  ;;  %s2219_s11 = sld [smem:[#allocation7 + $0x1d]] }
  0xa6   : > { %v916_v60 = vadd.f32 %v915_v53, %v914_v52  ;;  %v944_v61 = vmul.f32 %v943_v58, %v2010_v2  ;;  %v945_v62 = vmul.f32 %v943_v58, %v2013_v3  ;;  %v949_v63 = vmul.f32 %v948_v59, %v2020_v4 }
  0xa7   : > { %v933_v6 = vadd.f32 %v932_v35, %v930_v56  ;;  %v934_v7 = vadd.f32 %v932_v35, %v931_v57  ;;  %v950_v8 = vmul.f32 %v948_v59, %v2023_v5  ;;  %v953_v9 = vstv %s2162_s29  ;;  %s2226_s29 = sld [smem:[#allocation7 + $0x9d]] }
  0xa8   : > { %917 = vadd.xlane.f32.xlu1 %v916_v60  ;;  %v946_v10 = vadd.f32 %v944_v61, %v941_v54  ;;  %v947_v11 = vadd.f32 %v945_v62, %v942_v55  ;;  %v961_v12 = vstv %s2164_s16  ;;  %v964_v13 = vstv %s2166_s23  ;;  %s2228_s16 = sld [smem:[#allocation7 + $0x11d]] }
  0xa9   : > { %v935_v14 = vmax.f32 %v933_v6, 0.0  ;;  %v936_v15 = vmax.f32 %v934_v7, 0.0  ;;  %v962_v16 = vmul.f32 %v961_v12, %v2000_v0  ;;  %v963_v17 = vmul.f32 %v961_v12, %v2007_v1  ;;  %s2234_s23 = sld [smem:[#allocation8 + $0x1d]] }
  0xaa   : > { %v951_v18 = vadd.f32 %v949_v63, %v946_v10  ;;  %v952_v19 = vadd.f32 %v950_v8, %v947_v11  ;;  %v965_v20 = vmul.f32 %v964_v13, %v2010_v2  ;;  %v966_v21 = vmul.f32 %v964_v13, %v2013_v3 }
  0xab   : > { %v937_v22 = vadd.f32 %v936_v15, %v935_v14  ;;  %v969_v23 = vstv %s2173_s24  ;;  %v974_v24 = vstv %s2177_s26  ;;  %v982_v25 = vstv %s2179_s9  ;;  %s2236_s24 = sld [smem:[#allocation7 + $0x1e]] }
  0xac   : > { %v954_v26 = vadd.f32 %v953_v9, %v951_v18  ;;  %v955_v27 = vadd.f32 %v953_v9, %v952_v19  ;;  %v967_v28 = vadd.f32 %v965_v20, %v962_v16  ;;  %v968_v29 = vadd.f32 %v966_v21, %v963_v17  ;;  %s2238_s26 = sld [smem:[#allocation7 + $0x9e]] }
  0xad   : > { %938 = vadd.xlane.f32.xlu0 %v937_v22  ;;  %v970_v30 = vmul.f32 %v969_v23, %v2020_v4  ;;  %v971_v31 = vmul.f32 %v969_v23, %v2023_v5  ;;  %v983_v32 = vmul.f32 %v982_v25, %v2000_v0  ;;  %v984_v33 = vmul.f32 %v982_v25, %v2007_v1  ;;  %s2245_s9 = sld [smem:[#allocation7 + $0x11e]] }
  0xae   : > { %v956_v34 = vmax.f32 %v954_v26, 0.0  ;;  %v957_v35 = vmax.f32 %v955_v27, 0.0  ;;  %v985_v36 = vstv %s2188_s12  ;;  %v990_v37 = vstv %s2190_s13  ;;  %s2249_s12 = sld [smem:[#allocation8 + $0x1e]]  ;;  %s2251_s13 = sld [smem:[#allocation7 + $0x1f]] }
  0xaf   : > { %v972_v38 = vadd.f32 %v970_v30, %v967_v28  ;;  %v973_v39 = vadd.f32 %v971_v31, %v968_v29  ;;  %v986_v40 = vmul.f32 %v985_v36, %v2010_v2  ;;  %v987_v41 = vmul.f32 %v985_v36, %v2013_v3 }
  0xb0   : > { %v958_v42 = vadd.f32 %v957_v35, %v956_v34  ;;  %v991_v43 = vmul.f32 %v990_v37, %v2020_v4  ;;  %v992_v44 = vmul.f32 %v990_v37, %v2023_v5  ;;  %v995_v45 = vstv %s2196_s14  ;;  %s2260_s14 = sld [smem:[#allocation7 + $0x9f]] }
  0xb1   : > { %v975_v46 = vadd.f32 %v974_v24, %v972_v38  ;;  %v976_v47 = vadd.f32 %v974_v24, %v973_v39  ;;  %v988_v48 = vadd.f32 %v986_v40, %v983_v32  ;;  %v989_v49 = vadd.f32 %v987_v41, %v984_v33 }
  0xb2   : > { %959 = vadd.xlane.f32.xlu1 %v958_v42  ;;  %v1003_v50 = vstv %s2200_s8  ;;  %v1006_v51 = vstv %s2202_s10  ;;  %v1011_v52 = vstv %s2206_s30  ;;  %v1016_v53 = vstv %s2208_s7  ;;  %s2262_s8 = sld [smem:[#allocation7 + $0x11f]]  ;;  %s2272_s30 = sld [smem:[#allocation7]] }
  0xb3   : > { %v977_v54 = vmax.f32 %v975_v46, 0.0  ;;  %v978_v55 = vmax.f32 %v976_v47, 0.0  ;;  %v993_v56 = vadd.f32 %v991_v43, %v988_v48  ;;  %v994_v57 = vadd.f32 %v992_v44, %v989_v49  ;;  %s2268_s10 = sld [smem:[#allocation8 + $0x1f]]  ;;  %s2274_s7 = sld [smem:[#allocation7 + $0x80]] }
  0xb4   : > { %v1004_v58 = vmul.f32 %v1003_v50, %v2000_v0  ;;  %v1005_v59 = vmul.f32 %v1003_v50, %v2007_v1  ;;  %v1007_v60 = vmul.f32 %v1006_v51, %v2010_v2  ;;  %v1008_v61 = vmul.f32 %v1006_v51, %v2013_v3 }
  0xb5   : > { %v979_v62 = vadd.f32 %v978_v55, %v977_v54  ;;  %v996_v63 = vadd.f32 %v995_v45, %v993_v56  ;;  %v997_v6 = vadd.f32 %v995_v45, %v994_v57  ;;  %v1012_v7 = vmul.f32 %v1011_v52, %v2020_v4 }
  0xb6   : > { %v1009_v8 = vadd.f32 %v1007_v60, %v1004_v58  ;;  %v1010_v9 = vadd.f32 %v1008_v61, %v1005_v59  ;;  %v1013_v10 = vmul.f32 %v1011_v52, %v2023_v5  ;;  %v1024_v11 = vstv %s2219_s11  ;;  %s2278_s11 = sld [smem:[#allocation7 + $0x100]] }
  0xb7   : > { %980 = vadd.xlane.f32.xlu0 %v979_v62  ;;  %v998_v12 = vmax.f32 %v996_v63, 0.0  ;;  %v999_v13 = vmax.f32 %v997_v6, 0.0  ;;  %v1025_v14 = vmul.f32 %v1024_v11, %v2000_v0  ;;  %v1026_v15 = vmul.f32 %v1024_v11, %v2007_v1 }
  0xb8   : > { %v1014_v16 = vadd.f32 %v1012_v7, %v1009_v8  ;;  %v1015_v17 = vadd.f32 %v1013_v10, %v1010_v9  ;;  %v1027_v18 = vstv %s2226_s29  ;;  %v1032_v19 = vstv %s2228_s16  ;;  %s2280_s29 = sld [smem:[#allocation8]]  ;;  %s2291_s16 = sld [smem:[#allocation7 + $0x1]] }
  0xb9   : > { %v1000_v20 = vadd.f32 %v999_v13, %v998_v12  ;;  %v1028_v21 = vmul.f32 %v1027_v18, %v2010_v2  ;;  %v1029_v22 = vmul.f32 %v1027_v18, %v2013_v3  ;;  %v1033_v23 = vmul.f32 %v1032_v19, %v2020_v4 }
  0xba   : > { %v1017_v24 = vadd.f32 %v1016_v53, %v1014_v16  ;;  %v1018_v25 = vadd.f32 %v1016_v53, %v1015_v17  ;;  %v1034_v26 = vmul.f32 %v1032_v19, %v2023_v5  ;;  %v1037_v27 = vstv %s2234_s23  ;;  %s2298_s23 = sld [smem:[#allocation7 + $0x81]] }
  0xbb   : > { %1001 = vadd.xlane.f32.xlu1 %v1000_v20  ;;  %v1030_v28 = vadd.f32 %v1028_v21, %v1025_v14  ;;  %v1031_v29 = vadd.f32 %v1029_v22, %v1026_v15  ;;  %v1045_v30 = vstv %s2236_s24  ;;  %v1048_v31 = vstv %s2238_s26  ;;  %s2300_s24 = sld [smem:[#allocation7 + $0x101]] }
  0xbc   : > { %v1019_v32 = vmax.f32 %v1017_v24, 0.0  ;;  %v1020_v33 = vmax.f32 %v1018_v25, 0.0  ;;  %v1046_v34 = vmul.f32 %v1045_v30, %v2000_v0  ;;  %v1047_v35 = vmul.f32 %v1045_v30, %v2007_v1  ;;  %s2306_s26 = sld [smem:[#allocation8 + $0x1]] }
  0xbd   : > { %v1035_v36 = vadd.f32 %v1033_v23, %v1030_v28  ;;  %v1036_v37 = vadd.f32 %v1034_v26, %v1031_v29  ;;  %v1049_v38 = vmul.f32 %v1048_v31, %v2010_v2  ;;  %v1050_v39 = vmul.f32 %v1048_v31, %v2013_v3 }
  0xbe   : > { %v1021_v40 = vadd.f32 %v1020_v33, %v1019_v32  ;;  %v1053_v41 = vstv %s2245_s9  ;;  %v1058_v42 = vstv %s2249_s12  ;;  %v1066_v43 = vstv %s2251_s13  ;;  %s2308_s9 = sld [smem:[#allocation7 + $0x2]] }
  0xbf   : > { %v1038_v44 = vadd.f32 %v1037_v27, %v1035_v36  ;;  %v1039_v45 = vadd.f32 %v1037_v27, %v1036_v37  ;;  %v1051_v46 = vadd.f32 %v1049_v38, %v1046_v34  ;;  %v1052_v47 = vadd.f32 %v1050_v39, %v1047_v35  ;;  %s2310_s12 = sld [smem:[#allocation7 + $0x82]] }
  0xc0   : > { %1022 = vadd.xlane.f32.xlu0 %v1021_v40  ;;  %v1054_v48 = vmul.f32 %v1053_v41, %v2020_v4  ;;  %v1055_v49 = vmul.f32 %v1053_v41, %v2023_v5  ;;  %v1067_v50 = vmul.f32 %v1066_v43, %v2000_v0  ;;  %v1068_v51 = vmul.f32 %v1066_v43, %v2007_v1  ;;  %s2317_s13 = sld [smem:[#allocation7 + $0x102]] }
  0xc1   : > { %v1040_v52 = vmax.f32 %v1038_v44, 0.0  ;;  %v1041_v53 = vmax.f32 %v1039_v45, 0.0  ;;  %v1069_v54 = vstv %s2260_s14  ;;  %v1074_v55 = vstv %s2262_s8  ;;  %s2321_s14 = sld [smem:[#allocation8 + $0x2]]  ;;  %s2323_s8 = sld [smem:[#allocation7 + $0x3]] }
  0xc2   : > { %v1056_v56 = vadd.f32 %v1054_v48, %v1051_v46  ;;  %v1057_v57 = vadd.f32 %v1055_v49, %v1052_v47  ;;  %v1070_v58 = vmul.f32 %v1069_v54, %v2010_v2  ;;  %v1071_v59 = vmul.f32 %v1069_v54, %v2013_v3 }
  0xc3   : > { %v1042_v60 = vadd.f32 %v1041_v53, %v1040_v52  ;;  %v1075_v61 = vmul.f32 %v1074_v55, %v2020_v4  ;;  %v1076_v62 = vmul.f32 %v1074_v55, %v2023_v5  ;;  %v1079_v63 = vstv %s2268_s10  ;;  %s2332_s10 = sld [smem:[#allocation7 + $0x83]] }
  0xc4   : > { %v1059_v6 = vadd.f32 %v1058_v42, %v1056_v56  ;;  %v1060_v7 = vadd.f32 %v1058_v42, %v1057_v57  ;;  %v1072_v8 = vadd.f32 %v1070_v58, %v1067_v50  ;;  %v1073_v9 = vadd.f32 %v1071_v59, %v1068_v51 }
  0xc5   : > { %1043 = vadd.xlane.f32.xlu1 %v1042_v60  ;;  %v415_v10 = vstv %s2272_s30  ;;  %v418_v11 = vstv %s2274_s7  ;;  %v423_v12 = vstv %s2278_s11  ;;  %v428_v13 = vstv %s2280_s29  ;;  %s2334_s30 = sld [smem:[#allocation7 + $0x103]]  ;;  %s2344_s11 = sld [smem:[#allocation7 + $0x4]] }
  0xc6   : > { %v1061_v14 = vmax.f32 %v1059_v6, 0.0  ;;  %v1062_v15 = vmax.f32 %v1060_v7, 0.0  ;;  %v1077_v16 = vadd.f32 %v1075_v61, %v1072_v8  ;;  %v1078_v17 = vadd.f32 %v1076_v62, %v1073_v9  ;;  %s2340_s7 = sld [smem:[#allocation8 + $0x3]]  ;;  %s2346_s29 = sld [smem:[#allocation7 + $0x84]] }
  0xc7   : > { %v416_v18 = vmul.f32 %v415_v10, %v2000_v0  ;;  %v417_v19 = vmul.f32 %v415_v10, %v2007_v1  ;;  %v419_v20 = vmul.f32 %v418_v11, %v2010_v2  ;;  %v420_v21 = vmul.f32 %v418_v11, %v2013_v3 }
  0xc8   : > { %v1063_v22 = vadd.f32 %v1062_v15, %v1061_v14  ;;  %v1080_v23 = vadd.f32 %v1079_v63, %v1077_v16  ;;  %v1081_v24 = vadd.f32 %v1079_v63, %v1078_v17  ;;  %v424_v25 = vmul.f32 %v423_v12, %v2020_v4 }
  0xc9   : > { %v421_v26 = vadd.f32 %v419_v20, %v416_v18  ;;  %v422_v27 = vadd.f32 %v420_v21, %v417_v19  ;;  %v425_v28 = vmul.f32 %v423_v12, %v2023_v5  ;;  %v436_v29 = vstv %s2291_s16  ;;  %s2350_s16 = sld [smem:[#allocation7 + $0x104]] }
  0xca   : > { %1064 = vadd.xlane.f32.xlu0 %v1063_v22  ;;  %v1082_v30 = vmax.f32 %v1080_v23, 0.0  ;;  %v1083_v31 = vmax.f32 %v1081_v24, 0.0  ;;  %v437_v32 = vmul.f32 %v436_v29, %v2000_v0  ;;  %v438_v33 = vmul.f32 %v436_v29, %v2007_v1 }
  0xcb   : > { %v426_v34 = vadd.f32 %v424_v25, %v421_v26  ;;  %v427_v35 = vadd.f32 %v425_v28, %v422_v27  ;;  %v439_v36 = vstv %s2298_s23  ;;  %v444_v37 = vstv %s2300_s24  ;;  %s2352_s23 = sld [smem:[#allocation8 + $0x4]]  ;;  %s2363_s24 = sld [smem:[#allocation7 + $0x5]] }
  0xcc   : > { %v1084_v38 = vadd.f32 %v1083_v31, %v1082_v30  ;;  %v440_v39 = vmul.f32 %v439_v36, %v2010_v2  ;;  %v441_v40 = vmul.f32 %v439_v36, %v2013_v3  ;;  %v445_v41 = vmul.f32 %v444_v37, %v2020_v4 }
  0xcd   : > { %v429_v42 = vadd.f32 %v428_v13, %v426_v34  ;;  %v430_v43 = vadd.f32 %v428_v13, %v427_v35  ;;  %v446_v44 = vmul.f32 %v444_v37, %v2023_v5  ;;  %v449_v45 = vstv %s2306_s26  ;;  %s2370_s26 = sld [smem:[#allocation7 + $0x85]] }
  0xce   : > { %1085 = vadd.xlane.f32.xlu1 %v1084_v38  ;;  %v442_v46 = vadd.f32 %v440_v39, %v437_v32  ;;  %v443_v47 = vadd.f32 %v441_v40, %v438_v33  ;;  %v457_v48 = vstv %s2308_s9  ;;  %v460_v49 = vstv %s2310_s12  ;;  %s2372_s9 = sld [smem:[#allocation7 + $0x105]] }
  0xcf   : > { %v431_v50 = vmax.f32 %v429_v42, 0.0  ;;  %v432_v51 = vmax.f32 %v430_v43, 0.0  ;;  %v458_v52 = vmul.f32 %v457_v48, %v2000_v0  ;;  %v459_v53 = vmul.f32 %v457_v48, %v2007_v1  ;;  %s2378_s12 = sld [smem:[#allocation8 + $0x5]] }
  0xd0   : > { %v447_v54 = vadd.f32 %v445_v41, %v442_v46  ;;  %v448_v55 = vadd.f32 %v446_v44, %v443_v47  ;;  %v461_v56 = vmul.f32 %v460_v49, %v2010_v2  ;;  %v462_v57 = vmul.f32 %v460_v49, %v2013_v3 }
  0xd1   : > { %v433_v58 = vadd.f32 %v432_v51, %v431_v50  ;;  %v465_v59 = vstv %s2317_s13  ;;  %v470_v60 = vstv %s2321_s14  ;;  %v478_v61 = vstv %s2323_s8  ;;  %s2380_s13 = sld [smem:[#allocation7 + $0x6]] }
  0xd2   : > { %v450_v62 = vadd.f32 %v449_v45, %v447_v54  ;;  %v451_v63 = vadd.f32 %v449_v45, %v448_v55  ;;  %v463_v6 = vadd.f32 %v461_v56, %v458_v52  ;;  %v464_v7 = vadd.f32 %v462_v57, %v459_v53  ;;  %s2382_s14 = sld [smem:[#allocation7 + $0x86]] }
  0xd3   : > { %434 = vadd.xlane.f32.xlu0 %v433_v58  ;;  %v466_v8 = vmul.f32 %v465_v59, %v2020_v4  ;;  %v467_v9 = vmul.f32 %v465_v59, %v2023_v5  ;;  %v479_v10 = vmul.f32 %v478_v61, %v2000_v0  ;;  %v480_v11 = vmul.f32 %v478_v61, %v2007_v1  ;;  %s2389_s8 = sld [smem:[#allocation7 + $0x106]] }
  0xd4   : > { %v452_v12 = vmax.f32 %v450_v62, 0.0  ;;  %v453_v13 = vmax.f32 %v451_v63, 0.0  ;;  %v481_v14 = vstv %s2332_s10  ;;  %v486_v15 = vstv %s2334_s30  ;;  %s2393_s10 = sld [smem:[#allocation8 + $0x6]]  ;;  %s2395_s30 = sld [smem:[#allocation7 + $0x7]] }
  0xd5   : > { %v468_v16 = vadd.f32 %v466_v8, %v463_v6  ;;  %v469_v17 = vadd.f32 %v467_v9, %v464_v7  ;;  %v482_v18 = vmul.f32 %v481_v14, %v2010_v2  ;;  %v483_v19 = vmul.f32 %v481_v14, %v2013_v3  ;;  %v2415_v7 = vld [vmem:[%s1979_s27] sm:$0xff]  ;;  %v2431_v14 = vld [vmem:[%s1979_s27 + $0x18] sm:$0xff] }
  0xd6   : > { %v454_v20 = vadd.f32 %v453_v13, %v452_v12  ;;  %v487_v21 = vmul.f32 %v486_v15, %v2020_v4  ;;  %v488_v22 = vmul.f32 %v486_v15, %v2023_v5  ;;  %v491_v23 = vstv %s2340_s7  ;;  %s2404_s7 = sld [smem:[#allocation7 + $0x87]]  ;;  %v2427_v12 = vld [vmem:[%s1979_s27 + $0x10] sm:$0xff] }
  0xd7   : > { %v471_v24 = vadd.f32 %v470_v60, %v468_v16  ;;  %v472_v25 = vadd.f32 %v470_v60, %v469_v17  ;;  %v484_v26 = vadd.f32 %v482_v18, %v479_v10  ;;  %v485_v27 = vadd.f32 %v483_v19, %v480_v11 }
  0xd8   : > { %455 = vadd.xlane.f32.xlu1 %v454_v20  ;;  %v499_v28 = vstv %s2344_s11  ;;  %v502_v29 = vstv %s2346_s29  ;;  %v507_v30 = vstv %s2350_s16  ;;  %v512_v31 = vstv %s2352_s23  ;;  %s2406_s11 = sld [smem:[#allocation7 + $0x107]]  ;;  %s2422_s16 = sld [smem:[#allocation7 + $0x8]] }
  0xd9   : > { %v473_v32 = vmax.f32 %v471_v24, 0.0  ;;  %v474_v33 = vmax.f32 %v472_v25, 0.0  ;;  %v489_v34 = vadd.f32 %v487_v21, %v484_v26  ;;  %v490_v35 = vadd.f32 %v488_v22, %v485_v27  ;;  %s2412_s29 = sld [smem:[#allocation8 + $0x7]]  ;;  %s2424_s23 = sld [smem:[#allocation7 + $0x88]]  ;;  %v2442_v24 = vld [vmem:[%s1979_s27 + $0x20] sm:$0xff]  ;;  %v2446_v26 = vld [vmem:[%s1979_s27 + $0x28] sm:$0xff] }
  0xda   : > { %v500_v36 = vmul.f32 %v499_v28, %v2000_v0  ;;  %v501_v37 = vmul.f32 %v499_v28, %v2007_v1  ;;  %v503_v38 = vmul.f32 %v502_v29, %v2010_v2  ;;  %v504_v39 = vmul.f32 %v502_v29, %v2013_v3 }
  0xdb   : > { %v475_v40 = vadd.f32 %v474_v33, %v473_v32  ;;  %v492_v41 = vadd.f32 %v491_v23, %v489_v34  ;;  %v493_v42 = vadd.f32 %v491_v23, %v490_v35  ;;  %v508_v43 = vmul.f32 %v507_v30, %v2020_v4 }
  0xdc   : > { %v505_v44 = vadd.f32 %v503_v38, %v500_v36  ;;  %v506_v45 = vadd.f32 %v504_v39, %v501_v37  ;;  %v509_v46 = vmul.f32 %v507_v30, %v2023_v5  ;;  %v520_v47 = vstv %s2363_s24  ;;  %s2434_s24 = sld [smem:[#allocation7 + $0x108]] }
  0xdd   : > { %476 = vadd.xlane.f32.xlu0 %v475_v40  ;;  %v494_v48 = vmax.f32 %v492_v41, 0.0  ;;  %v495_v49 = vmax.f32 %v493_v42, 0.0  ;;  %v521_v50 = vmul.f32 %v520_v47, %v2000_v0  ;;  %v522_v51 = vmul.f32 %v520_v47, %v2007_v1 }
  0xde   : > { %v510_v52 = vadd.f32 %v508_v43, %v505_v44  ;;  %v511_v53 = vadd.f32 %v509_v46, %v506_v45  ;;  %v523_v54 = vstv %s2370_s26  ;;  %v528_v55 = vstv %s2372_s9  ;;  %s2436_s26 = sld [smem:[#allocation8 + $0x8]]  ;;  %s2453_s9 = sld [smem:[#allocation7 + $0x9]] }
  0xdf   : > { %v496_v56 = vadd.f32 %v495_v49, %v494_v48  ;;  %v524_v57 = vmul.f32 %v523_v54, %v2010_v2  ;;  %v525_v58 = vmul.f32 %v523_v54, %v2013_v3  ;;  %v529_v59 = vmul.f32 %v528_v55, %v2020_v4 }
  0xe0   : > { %v513_v0 = vadd.f32 %v512_v31, %v510_v52  ;;  %v514_v1 = vadd.f32 %v512_v31, %v511_v53  ;;  %v530_v60 = vmul.f32 %v528_v55, %v2023_v5  ;;  %v533_v61 = vstv %s2378_s12  ;;  %v2419_v5 = vld [vmem:[%s1979_s27 + $0x8] sm:$0xff]  ;;  %s2460_s27 = sld [smem:[#allocation7 + $0x89]] }
  0xe1   : > { %497 = vadd.xlane.f32.xlu1 %v496_v56  ;;  %v526_v62 = vadd.f32 %v524_v57, %v521_v50  ;;  %v527_v63 = vadd.f32 %v525_v58, %v522_v51  ;;  %v541_v2 = vstv %s2380_s13  ;;  %v544_v3 = vstv %s2382_s14  ;;  %s2462_s12 = sld [smem:[#allocation7 + $0x109]]  ;;  %s2470_s14 = sld [smem:[#allocation7 + $0xa]] }
  0xe2   : > { %v515_v4 = vmax.f32 %v513_v0, 0.0  ;;  %v516_v6 = vmax.f32 %v514_v1, 0.0  ;;  %v542_v8 = vmul.f32 %v2415_v7, %v541_v2  ;;  %v543_v9 = vmul.f32 %v2419_v5, %v541_v2  ;;  %s2468_s13 = sld [smem:[#allocation8 + $0x9]] }
  0xe3   : > { %v531_v10 = vadd.f32 %v529_v59, %v526_v62  ;;  %v532_v11 = vadd.f32 %v530_v60, %v527_v63  ;;  %v545_v13 = vmul.f32 %v2427_v12, %v544_v3  ;;  %v546_v15 = vmul.f32 %v2431_v14, %v544_v3 }
  0xe4   : > { %v517_v16 = vadd.f32 %v516_v6, %v515_v4  ;;  %v549_v17 = vstv %s2389_s8  ;;  %v554_v18 = vstv %s2393_s10  ;;  %v562_v19 = vstv %s2395_s30  ;;  %s2472_s8 = sld [smem:[#allocation7 + $0x8a]] }
  0xe5   : > { %v534_v20 = vadd.f32 %v533_v61, %v531_v10  ;;  %v535_v21 = vadd.f32 %v533_v61, %v532_v11  ;;  %v547_v22 = vadd.f32 %v545_v13, %v542_v8  ;;  %v548_v23 = vadd.f32 %v546_v15, %v543_v9  ;;  %s2479_s10 = sld [smem:[#allocation7 + $0x10a]] }
  0xe6   : > { %518 = vadd.xlane.f32.xlu0 %v517_v16  ;;  %v550_v25 = vmul.f32 %v2442_v24, %v549_v17  ;;  %v551_v27 = vmul.f32 %v2446_v26, %v549_v17  ;;  %v563_v28 = vmul.f32 %v2415_v7, %v562_v19  ;;  %v564_v29 = vmul.f32 %v2419_v5, %v562_v19  ;;  %s2483_s30 = sld [smem:[#allocation8 + $0xa]] }
  0xe7   : > { %v536_v30 = vmax.f32 %v534_v20, 0.0  ;;  %v537_v31 = vmax.f32 %v535_v21, 0.0  ;;  %v565_v32 = vstv %s2404_s7  ;;  %v570_v33 = vstv %s2406_s11  ;;  %s2485_s7 = sld [smem:[#allocation7 + $0xb]] }
  0xe8   : > { %v552_v34 = vadd.f32 %v550_v25, %v547_v22  ;;  %v553_v35 = vadd.f32 %v551_v27, %v548_v23  ;;  %v566_v36 = vmul.f32 %v2427_v12, %v565_v32  ;;  %v567_v37 = vmul.f32 %v2431_v14, %v565_v32  ;;  %s2494_s11 = sld [smem:[#allocation7 + $0x8b]] }
  0xe9   : > { %v538_v38 = vadd.f32 %v537_v31, %v536_v30  ;;  %v571_v39 = vmul.f32 %v2442_v24, %v570_v33  ;;  %v572_v40 = vmul.f32 %v2446_v26, %v570_v33  ;;  %v575_v41 = vstv %s2412_s29  ;;  %s2496_s29 = sld [smem:[#allocation7 + $0x10b]] }
  0xea   : > { %v555_v42 = vadd.f32 %v554_v18, %v552_v34  ;;  %v556_v43 = vadd.f32 %v554_v18, %v553_v35  ;;  %v568_v44 = vadd.f32 %v566_v36, %v563_v28  ;;  %v569_v45 = vadd.f32 %v567_v37, %v564_v29 }
  0xeb   : > { %539 = vadd.xlane.f32.xlu1 %v538_v38  ;;  %v583_v46 = vstv %s2422_s16  ;;  %v586_v47 = vstv %s2424_s23  ;;  %v591_v48 = vstv %s2434_s24  ;;  %v596_v49 = vstv %s2436_s26  ;;  %s2502_s16 = sld [smem:[#allocation8 + $0xb]]  ;;  %s2506_s23 = sld [smem:[#allocation7 + $0xc]] }
  0xec   : > { %v557_v50 = vmax.f32 %v555_v42, 0.0  ;;  %v558_v51 = vmax.f32 %v556_v43, 0.0  ;;  %v573_v52 = vadd.f32 %v571_v39, %v568_v44  ;;  %v574_v53 = vadd.f32 %v572_v40, %v569_v45  ;;  %s2508_s24 = sld [smem:[#allocation7 + $0x8c]] }
  0xed   : > { %v584_v54 = vmul.f32 %v2415_v7, %v583_v46  ;;  %v585_v55 = vmul.f32 %v2419_v5, %v583_v46  ;;  %v587_v56 = vmul.f32 %v2427_v12, %v586_v47  ;;  %v588_v57 = vmul.f32 %v2431_v14, %v586_v47  ;;  %s2512_s26 = sld [smem:[#allocation7 + $0x10c]] }
  0xee   : > { %v559_v58 = vadd.f32 %v558_v51, %v557_v50  ;;  %v576_v59 = vadd.f32 %v575_v41, %v573_v52  ;;  %v577_v0 = vadd.f32 %v575_v41, %v574_v53  ;;  %v592_v1 = vmul.f32 %v2442_v24, %v591_v48 }
  0xef   : > { %v589_v60 = vadd.f32 %v587_v56, %v584_v54  ;;  %v590_v61 = vadd.f32 %v588_v57, %v585_v55  ;;  %v593_v62 = vmul.f32 %v2446_v26, %v591_v48  ;;  %v604_v63 = vstv %s2453_s9  ;;  %s2514_s9 = sld [smem:[#allocation8 + $0xc]] }
  0xf0   : > { %560 = vadd.xlane.f32.xlu0 %v559_v58  ;;  %v578_v2 = vmax.f32 %v576_v59, 0.0  ;;  %v579_v3 = vmax.f32 %v577_v0, 0.0  ;;  %v605_v4 = vmul.f32 %v2415_v7, %v604_v63  ;;  %v606_v6 = vmul.f32 %v2419_v5, %v604_v63 }
  0xf1   : > { %v594_v8 = vadd.f32 %v592_v1, %v589_v60  ;;  %v595_v9 = vadd.f32 %v593_v62, %v590_v61  ;;  %v607_v10 = vstv %s2460_s27  ;;  %v612_v11 = vstv %s2462_s12  ;;  %s2525_s27 = sld [smem:[#allocation7 + $0xd]] }
  0xf2   : > { %v580_v13 = vadd.f32 %v579_v3, %v578_v2  ;;  %v608_v15 = vmul.f32 %v2427_v12, %v607_v10  ;;  %v609_v16 = vmul.f32 %v2431_v14, %v607_v10  ;;  %v613_v17 = vmul.f32 %v2442_v24, %v612_v11  ;;  %s2532_s12 = sld [smem:[#allocation7 + $0x8d]] }
  0xf3   : > { %v597_v18 = vadd.f32 %v596_v49, %v594_v8  ;;  %v598_v19 = vadd.f32 %v596_v49, %v595_v9  ;;  %v614_v20 = vmul.f32 %v2446_v26, %v612_v11  ;;  %v617_v21 = vstv %s2468_s13  ;;  %s2534_s13 = sld [smem:[#allocation7 + $0x10d]] }
  0xf4   : > { %581 = vadd.xlane.f32.xlu1 %v580_v13  ;;  %v610_v22 = vadd.f32 %v608_v15, %v605_v4  ;;  %v611_v23 = vadd.f32 %v609_v16, %v606_v6  ;;  %v625_v25 = vstv %s2470_s14  ;;  %v628_v27 = vstv %s2472_s8  ;;  %s2540_s14 = sld [smem:[#allocation8 + $0xd]]  ;;  %s2542_s8 = sld [smem:[#allocation7 + $0xe]] }
  0xf5   : > { %v599_v28 = vmax.f32 %v597_v18, 0.0  ;;  %v600_v29 = vmax.f32 %v598_v19, 0.0  ;;  %v626_v30 = vmul.f32 %v2415_v7, %v625_v25  ;;  %v627_v31 = vmul.f32 %v2419_v5, %v625_v25 }
  0xf6   : > { %v615_v32 = vadd.f32 %v613_v17, %v610_v22  ;;  %v616_v33 = vadd.f32 %v614_v20, %v611_v23  ;;  %v629_v34 = vmul.f32 %v2427_v12, %v628_v27  ;;  %v630_v35 = vmul.f32 %v2431_v14, %v628_v27 }
  0xf7   : > { %v601_v36 = vadd.f32 %v600_v29, %v599_v28  ;;  %v633_v37 = vstv %s2479_s10  ;;  %v638_v38 = vstv %s2483_s30  ;;  %v646_v39 = vstv %s2485_s7  ;;  %s2544_s10 = sld [smem:[#allocation7 + $0x8e]] }
  0xf8   : > { %v618_v40 = vadd.f32 %v617_v21, %v615_v32  ;;  %v619_v41 = vadd.f32 %v617_v21, %v616_v33  ;;  %v631_v42 = vadd.f32 %v629_v34, %v626_v30  ;;  %v632_v43 = vadd.f32 %v630_v35, %v627_v31  ;;  %s2551_s30 = sld [smem:[#allocation7 + $0x10e]] }
  0xf9   : > { %602 = vadd.xlane.f32.xlu0 %v601_v36  ;;  %v634_v44 = vmul.f32 %v2442_v24, %v633_v37  ;;  %v635_v45 = vmul.f32 %v2446_v26, %v633_v37  ;;  %v647_v46 = vmul.f32 %v2415_v7, %v646_v39  ;;  %v648_v47 = vmul.f32 %v2419_v5, %v646_v39  ;;  %s2555_s7 = sld [smem:[#allocation8 + $0xe]] }
  0xfa   : > { %v620_v48 = vmax.f32 %v618_v40, 0.0  ;;  %v621_v49 = vmax.f32 %v619_v41, 0.0  ;;  %v649_v50 = vstv %s2494_s11  ;;  %v654_v51 = vstv %s2496_s29  ;;  %s2557_s11 = sld [smem:[#allocation7 + $0xf]] }
  0xfb   : > { %v636_v52 = vadd.f32 %v634_v44, %v631_v42  ;;  %v637_v53 = vadd.f32 %v635_v45, %v632_v43  ;;  %v650_v54 = vmul.f32 %v2427_v12, %v649_v50  ;;  %v651_v55 = vmul.f32 %v2431_v14, %v649_v50  ;;  %s2566_s29 = sld [smem:[#allocation7 + $0x8f]] }
  0xfc   : > { %v622_v56 = vadd.f32 %v621_v49, %v620_v48  ;;  %v655_v57 = vmul.f32 %v2442_v24, %v654_v51  ;;  %v656_v58 = vmul.f32 %v2446_v26, %v654_v51  ;;  %v659_v59 = vstv %s2502_s16  ;;  %s2568_s16 = sld [smem:[#allocation7 + $0x10f]] }
  0xfd   : > { %v639_v0 = vadd.f32 %v638_v38, %v636_v52  ;;  %v640_v1 = vadd.f32 %v638_v38, %v637_v53  ;;  %v652_v60 = vadd.f32 %v650_v54, %v647_v46  ;;  %v653_v61 = vadd.f32 %v651_v55, %v648_v47 }
  0xfe   : > { %623 = vadd.xlane.f32.xlu1 %v622_v56  ;;  %v667_v62 = vstv %s2506_s23  ;;  %v670_v63 = vstv %s2508_s24  ;;  %v675_v2 = vstv %s2512_s26  ;;  %v680_v3 = vstv %s2514_s9  ;;  %s2578_s23 = sld [smem:[#allocation8 + $0xf]]  ;;  %s1776_s24 = smov 16  }
  0xff   : > { %v641_v4 = vmax.f32 %v639_v0, 0.0  ;;  %v642_v6 = vmax.f32 %v640_v1, 0.0  ;;  %v657_v8 = vadd.f32 %v655_v57, %v652_v60  ;;  %v658_v9 = vadd.f32 %v656_v58, %v653_v61  ;;  %s1354_s26 = sshll.u32 %s1975_s15, 3 }
 0x100   : > { %v668_v10 = vmul.f32 %v2415_v7, %v667_v62  ;;  %v669_v11 = vmul.f32 %v2419_v5, %v667_v62  ;;  %v671_v13 = vmul.f32 %v2427_v12, %v670_v63  ;;  %v672_v15 = vmul.f32 %v2431_v14, %v670_v63 }
 0x101   : > { %v643_v16 = vadd.f32 %v642_v6, %v641_v4  ;;  %v660_v17 = vadd.f32 %v659_v59, %v657_v8  ;;  %v661_v18 = vadd.f32 %v659_v59, %v658_v9  ;;  %v676_v19 = vmul.f32 %v2442_v24, %v675_v2 }
 0x102   : > { %v673_v20 = vadd.f32 %v671_v13, %v668_v10  ;;  %v674_v21 = vadd.f32 %v672_v15, %v669_v11  ;;  %v677_v22 = vmul.f32 %v2446_v26, %v675_v2  ;;  %v688_v23 = vstv %s2525_s27 }
 0x103   : > { %644 = vadd.xlane.f32.xlu0 %v643_v16  ;;  %v662_v25 = vmax.f32 %v660_v17, 0.0  ;;  %v663_v27 = vmax.f32 %v661_v18, 0.0  ;;  %v689_v28 = vmul.f32 %v2415_v7, %v688_v23  ;;  %v690_v29 = vmul.f32 %v2419_v5, %v688_v23 }
 0x104   : > { %v678_v30 = vadd.f32 %v676_v19, %v673_v20  ;;  %v679_v31 = vadd.f32 %v677_v22, %v674_v21  ;;  %v691_v32 = vstv %s2532_s12  ;;  %v696_v33 = vstv %s2534_s13  ;;  %s1484_s12 = sshll.u32 %s1829_s22, 7  ;;  %s280_s13 = scalar_lea.vmem [#allocation11], %s1354_s26 }
 0x105   : > { %v664_v34 = vadd.f32 %v663_v27, %v662_v25  ;;  %v692_v35 = vmul.f32 %v2427_v12, %v691_v32  ;;  %v693_v36 = vmul.f32 %v2431_v14, %v691_v32  ;;  %v697_v37 = vmul.f32 %v2442_v24, %v696_v33  ;;  %s1777_s22 = smov [#allocation11]  }
 0x106   : > { %v681_v38 = vadd.f32 %v680_v3, %v678_v30  ;;  %v682_v39 = vadd.f32 %v680_v3, %v679_v31  ;;  %v698_v40 = vmul.f32 %v2446_v26, %v696_v33  ;;  %v701_v41 = vstv %s2540_s14  ;;  %v1141_v30 = vld [vmem:[#allocation9 + $0x10] sm:$0xff]  ;;  %v1142_v33 = vld [vmem:[#allocation9 + $0x18] sm:$0xff]  ;;  %s1239_s14 = sshll.u32 %s280_s13, 4  ;;  %s2634_s14 = int_to_ptr.vmem [resolvable:$true] %s1239_s14 }
 0x107   : > { %665 = vadd.xlane.f32.xlu1 %v664_v34  ;;  %v694_v42 = vadd.f32 %v692_v35, %v689_v28  ;;  %v695_v43 = vadd.f32 %v693_v36, %v690_v29  ;;  %v709_v44 = vstv %s2542_s8  ;;  %v712_v45 = vstv %s2544_s10 }
 0x108   : > { %v683_v46 = vmax.f32 %v681_v38, 0.0  ;;  %v684_v47 = vmax.f32 %v682_v39, 0.0  ;;  %v710_v48 = vmul.f32 %v2415_v7, %v709_v44  ;;  %v711_v49 = vmul.f32 %v2419_v5, %v709_v44 }
 0x109   : > { %v699_v50 = vadd.f32 %v697_v37, %v694_v42  ;;  %v700_v51 = vadd.f32 %v698_v40, %v695_v43  ;;  %v713_v52 = vmul.f32 %v2427_v12, %v712_v45  ;;  %v714_v53 = vmul.f32 %v2431_v14, %v712_v45 }
 0x10a   : > { %v685_v54 = vadd.f32 %v684_v47, %v683_v46  ;;  %v717_v55 = vstv %s2551_s30  ;;  %v722_v56 = vstv %s2555_s7  ;;  %v730_v57 = vstv %s2557_s11  ;;  %s2632_s30 = scalar_lea.hbm %s2681_s5, %s1484_s12  ;;  %s1226_s7 = scalar_lea.sflag [#allocation4], %s1975_s15 }
 0x10b   : > { %v702_v58 = vadd.f32 %v701_v41, %v699_v50  ;;  %v703_v59 = vadd.f32 %v701_v41, %v700_v51  ;;  %v715_v0 = vadd.f32 %v713_v52, %v710_v48  ;;  %v716_v1 = vadd.f32 %v714_v53, %v711_v49  ;;  %s1687_s11 = scalar_lea.vmem %s2634_s14, 128 }
 0x10c   : > { %686 = vadd.xlane.f32.xlu0 %v685_v54  ;;  %v718_v60 = vmul.f32 %v2442_v24, %v717_v55  ;;  %v719_v61 = vmul.f32 %v2446_v26, %v717_v55  ;;  %v731_v62 = vmul.f32 %v2415_v7, %v730_v57  ;;  %v732_v63 = vmul.f32 %v2419_v5, %v730_v57  ;;  %p1688_p6 = scmp.ne.s32.totalorder %s2634_s14, %s1687_s11 }
 0x10d   : > { %v704_v2 = vmax.f32 %v702_v58, 0.0  ;;  %v705_v3 = vmax.f32 %v703_v59, 0.0  ;;  %v733_v4 = vstv %s2566_s29  ;;  %v738_v6 = vstv %s2568_s16  ;;  %s1691_s29 = sshll.u32 %s1777_s22, 4  ;;  %s1692_s29 = int_to_ptr.vmem [resolvable:$false] %s1691_s29 }
 0x10e   : > { %v720_v8 = vadd.f32 %v718_v60, %v715_v0  ;;  %v721_v9 = vadd.f32 %v719_v61, %v716_v1  ;;  %v734_v10 = vmul.f32 %v2427_v12, %v733_v4  ;;  %v735_v11 = vmul.f32 %v2431_v14, %v733_v4  ;;  %p1689_p12 = pnand %p1688_p6, %p2699_p9  ;;  %s1693_s16 = scalar_lea.vmem %s1692_s29, 256 }
 0x10f   : > { %v706_v13 = vadd.f32 %v705_v3, %v704_v2  ;;  %v739_v15 = vmul.f32 %v2442_v24, %v738_v6  ;;  %v740_v16 = vmul.f32 %v2446_v26, %v738_v6  ;;  %v743_v19 = vstv %s2578_s23  ;;  %v1139_v24 = vld [vmem:[#allocation9] sm:$0xff]  ;;  %v1140_v26 = vld [vmem:[#allocation9 + $0x8] sm:$0xff]  ;;  %p1694_p13 = scmp.lt.s32.totalorder %s2634_s14, %s1692_s29  ;;  %p1695_p7 = scmp.lt.s32.totalorder %s1693_s16, %s1687_s11 }
 0x110   : > { %v723_v17 = vadd.f32 %v722_v56, %v720_v8  ;;  %v724_v7 = vadd.f32 %v722_v56, %v721_v9  ;;  %v736_v18 = vadd.f32 %v734_v10, %v731_v62  ;;  %v737_v5 = vadd.f32 %v735_v11, %v732_v63  ;;  %p1690_p3 = pneg %p1689_p12 }
 0x111   : > { %707 = vadd.xlane.f32.xlu1 %v706_v13  ;;  %v1773_v31 = vmov 0.0|0.0   ;;  %v1504_v32 = vpack.c.bf16 %v1140_v26, %v1139_v24  ;;  %v1507_v34 = vpack.c.bf16 %v1142_v33, %v1141_v30  ;;  %v1775_v56 = vmov 0.0   ;;  %p1696_p1 = por %p1695_p7, %p1694_p13 }
 0x112   : > { %v725_v20 = vmax.f32 %v723_v17, 0.0  ;;  %v726_v21 = vmax.f32 %v724_v7, 0.0  ;;  %v741_v22 = vadd.f32 %v739_v15, %v736_v18  ;;  %v742_v23 = vadd.f32 %v740_v16, %v737_v5  ;;  %1503 = vmatprep.subr.bf16.mxu0 %v1773_v31  ;;  %1500 = vmatprep.mubr.msk.f32.mxu0 %vm1774_vm10, %v1775_v56 }
 0x113   : > { %1505 = vmatpush3.bf16.msra.mxu0 %v1504_v32  ;;  %p1697_p4 = pnand %p1696_p1, %p1690_p3 }
 0x114   : > { %v727_v25 = vadd.f32 %v726_v21, %v725_v20  ;;  %v744_v27 = vadd.f32 %v743_v19, %v741_v22  ;;  %v745_v12 = vadd.f32 %v743_v19, %v742_v23  ;;  %1506 = vmatprep.subr.bf16.mxu0 %v1773_v31 }
 0x116   : > { %728 = vadd.xlane.f32.xlu0 %v727_v25  ;;  %v746_v14 = vmax.f32 %v744_v27, 0.0  ;;  %v747_v28 = vmax.f32 %v745_v12, 0.0  ;;  %v771_v35 = vpop.xlane.xlu0 %770 }
 0x117   : > { %1508 = vmatpush3.bf16.msra.mxu0 %v1507_v34 }
 0x118   : > { %v748_v29 = vadd.f32 %v747_v28, %v746_v14 }
 0x119   : > { %v813_v36 = vpop.xlane.xlu1 %812 }
 0x11a   : > { %749 = vadd.xlane.f32.xlu1 %v748_v29 }
 0x11e   : > { %v792_v37 = vpop.xlane.xlu0 %791 }
 0x11f   : > { %v1117_v40 = vsel %vm1087_vm0, %v771_v35, %v792_v37 }
 0x120   : > { %v1118_v42 = vsel %vm1089_vm1, %v1117_v40, %v813_v36  ;;  %v1481_v36 = vld [vmem:[%s2680_s4] ss:$0 sm:$0xff] }
 0x123   : > { %v834_v38 = vpop.xlane.xlu1 %833 }
 0x124   : > { %v1119_v44 = vsel %vm1091_vm2, %v1118_v42, %v834_v38 }
 0x127   : > { %v855_v39 = vpop.xlane.xlu0 %854 }
 0x128   : > { %v1120_v46 = vsel %vm1093_vm3, %v1119_v44, %v855_v39 }
 0x12c   : > { %v876_v41 = vpop.xlane.xlu1 %875 }
 0x12d   : > { %v1121_v48 = vsel %vm1095_vm4, %v1120_v46, %v876_v41 }
 0x131   : > { %v897_v43 = vpop.xlane.xlu0 %896 }
 0x132   : > { %v1122_v49 = vsel %vm1097_vm5, %v1121_v48, %v897_v43 }
 0x135   : > { %v918_v45 = vpop.xlane.xlu1 %917 }
 0x136   : > { %v1123_v52 = vsel %vm1099_vm6, %v1122_v49, %v918_v45 }
 0x13a   : > { %v939_v47 = vpop.xlane.xlu0 %938 }
 0x13b   : > { %v1124_v53 = vsel %vm1101_vm7, %v1123_v52, %v939_v47 }
 0x13f   : > { %v960_v50 = vpop.xlane.xlu1 %959 }
 0x140   : > { %v1125_v55 = vsel %vm1103_vm8, %v1124_v53, %v960_v50 }
 0x144   : > { %v981_v51 = vpop.xlane.xlu0 %980 }
 0x145   : > { %v1126_v57 = vsel %vm1105_vm9, %v1125_v55, %v981_v51 }
 0x148   : > { %v1002_v54 = vpop.xlane.xlu1 %1001 }
 0x149   : > { %v1127_v59 = vsel %vm1107_vm11, %v1126_v57, %v1002_v54 }
 0x14d   : > { %v1023_v58 = vpop.xlane.xlu0 %1022 }
 0x14e   : > { %v1128_v0 = vsel %vm1109_vm12, %v1127_v59, %v1023_v58 }
 0x152   : > { %v1044_v1 = vpop.xlane.xlu1 %1043 }
 0x153   : > { %v1129_v61 = vsel %vm1111_vm13, %v1128_v0, %v1044_v1 }
 0x157   : > { %v1065_v60 = vpop.xlane.xlu0 %1064 }
 0x158   : > { %v1130_v62 = vsel %vm1113_vm14, %v1129_v61, %v1065_v60 }
 0x15b   : > { %v1086_v63 = vpop.xlane.xlu1 %1085 }
 0x15c   : > { %v1131_v2 = vsel %vm1115_vm15, %v1130_v62, %v1086_v63 }
 0x15d   : > { %1133 = vrot.lane.b32.xlu0 %v1131_v2, %s1776_s24 }
 0x160   : > { %v435_v3 = vpop.xlane.xlu0 %434 }
 0x165   : > { %v456_v4 = vpop.xlane.xlu1 %455 }
 0x166   : > { %v1088_v6 = vsel %vm1087_vm0, %v435_v3, %v456_v4  ;;  %vm1136_vm0 = vcmask 130048  }
 0x16a   : > { %v477_v8 = vpop.xlane.xlu0 %476 }
 0x16b   : > { %v1090_v9 = vsel %vm1089_vm1, %v1088_v6, %v477_v8  ;;  %vm1150_vm1 = vcmask 261120  }
 0x16e   : > { %v498_v10 = vpop.xlane.xlu1 %497 }
 0x16f   : > { %v1092_v11 = vsel %vm1091_vm2, %v1090_v9, %v498_v10 }
 0x173   : > { %v519_v13 = vpop.xlane.xlu0 %518 }
 0x174   : > { %v1094_v15 = vsel %vm1093_vm3, %v1092_v11, %v519_v13 }
 0x178   : > { %v540_v16 = vpop.xlane.xlu1 %539 }
 0x179   : > { %v1096_v17 = vsel %vm1095_vm4, %v1094_v15, %v540_v16 }
 0x17d   : > { %v561_v7 = vpop.xlane.xlu0 %560 }
 0x17e   : > { %v1098_v18 = vsel %vm1097_vm5, %v1096_v17, %v561_v7 }
 0x181   : > { %v582_v5 = vpop.xlane.xlu1 %581 }
 0x182   : > { %v1100_v19 = vsel %vm1099_vm6, %v1098_v18, %v582_v5 }
 0x186   : > { %v603_v20 = vpop.xlane.xlu0 %602 }
 0x187   : > { %v1102_v21 = vsel %vm1101_vm7, %v1100_v19, %v603_v20 }
 0x18b   : > { %v624_v22 = vpop.xlane.xlu1 %623 }
 0x18c   : > { %v1104_v23 = vsel %vm1103_vm8, %v1102_v21, %v624_v22 }
 0x190   : > { %v645_v25 = vpop.xlane.xlu0 %644 }
 0x191   : > { %v1106_v27 = vsel %vm1105_vm9, %v1104_v23, %v645_v25 }
 0x194   : > { %v666_v12 = vpop.xlane.xlu1 %665 }
 0x195   : > { %v1108_v14 = vsel %vm1107_vm11, %v1106_v27, %v666_v12 }
 0x199   : > { %v687_v28 = vpop.xlane.xlu0 %686 }
 0x19a   : > { %v1110_v29 = vsel %vm1109_vm12, %v1108_v14, %v687_v28 }
 0x19e   : > { %v708_v24 = vpop.xlane.xlu1 %707 }
 0x19f   : > { %v1112_v26 = vsel %vm1111_vm13, %v1110_v29, %v708_v24 }
 0x1a3   : > { %v729_v30 = vpop.xlane.xlu0 %728 }
 0x1a4   : > { %v1114_v31 = vsel %vm1113_vm14, %v1112_v26, %v729_v30 }
 0x1a7   : > { %v750_v32 = vpop.xlane.xlu1 %749 }
 0x1a8   : > { %v1116_v33 = vsel %vm1115_vm15, %v1114_v31, %v750_v32 }
 0x1cf   : > { %v1134_v34 = vpop.permute.xlu0 %1133 }
 0x1d0   : > { %v1137_v35 = vsel %vm1136_vm0, %v1116_v33, %v1134_v34 }
 0x1d1   : > { %1501 = vmatmul.mubr.msk.f32.vlgmr.msra.gmra.mrb[0].mxu0 %vm1150_vm1, %v1137_v35 }
 0x2a4   : > { %v1220_v37 = vpop.f32.mrb[0].mxu0 }
 0x2a5   : > { %v1221_v38 = vadd.f32 %v1481_v36, %v1220_v37  ;;  %v1502_v39 = vpop.f32.mrb[1].mxu0 }
 0x2a7   : > { %1224 = vst [vmem:[%s280_s13] sm:$0xff] %v1221_v38 }
 0x2a8   : > { %1700 = shalt.err (!%p1697_p4)
}
 0x2a9   : > { %s1701_s15 = scalar_lea.hbm %s2632_s30, 128  ;;  %s1705_s26 = scalar_lea.hbm %s2681_s5, 256 }
 0x2aa   : > { %p1702_p10 = scmp.ne.s32.totalorder %s2632_s30, %s1701_s15  ;;  %p1706_p0 = scmp.lt.u32.totalorder %s2632_s30, %s2681_s5 }
 0x2ab   : > { %p1707_p5 = scmp.lt.u32.totalorder %s1705_s26, %s1701_s15  ;;  %p1709_p6 = scmp.lt.u32.totalorder %s1701_s15, %s2632_s30 }
 0x2ac   : > { %p1703_p8 = pnand %p1702_p10, %p2699_p9 }
 0x2ad   : > { %p1708_p2 = por %p1707_p5, %p1706_p0 }
 0x2ae   : > { %p1704_p11 = pneg %p1703_p8 }
 0x2af   : > { %p1710_p12 = por %p1709_p6, %p1708_p2 }
 0x2b1   : > { %p1711_p3 = pnand %p1710_p12, %p1704_p11 }
 0x2b3   : > { %1714 = shalt.err (!%p1711_p3)
}
 0x2b4   : > { %1526 = dma.vmem_to_hbm [thread:$0]  (%p2699_p9), %s2634_s14, 128, %s2632_s30, %s1226_s7  }
 0x2b5 PF: > { %s1251_s12 = sand.u32 1, %s1753_s18   ;;  %p2700_p13 = scmp.ne.s32.totalorder %s2686_s25, 0 }
 0x2b6   : > { %p2701_p7 = scmp.ge.s32.totalorder %s1765_s21, 2  ;;  %s1252_s13 = scalar_lea.sflag [#allocation4], %s1251_s12 }
 0x2b8   : > { %p1543_p1 = pnand %p2701_p7, %p2700_p13 }
 0x2ba   : > { %1748 = dma.done.wait (!%p1543_p1), %s1252_s13, 128  }
 0x2bb   : > { %1750 = vsyncadd (!%p1543_p1), %s1252_s13, 4294967168  ;;  %p21_p4 = scmp.ge.s32.totalorder %s1916_s17, 4   ;;  %s2702_s18 = smov %s1757_s19 }
 0x2bc   : > { %s2703_s19 = smov %s1761_s20  ;;  %s2704_s20 = smov %s1926_s28 }
 0x2bd   : > { %s2705_s21 = smov %s1916_s17  ;;  %23 = sbr.rel (!%p21_p4) target bundleno = 8 (0x8), region = 99 }
 0x2c4   :  { %1257 = vsyncpa [#allocation3], 1 }
 0x2c5   :  { %1259 = vsyncpa [#allocation3 + $0x1], 1 }
 0x2c6   :  { %1260 = vsyncpa [#allocation10], 1 }
 0x2c7   :  { %1261 = vsyncpa [#allocation4], 1 }
 0x2c8   :  { %1263 = vsyncpa [#allocation4 + $0x1], 1 }
 0x2c9   :  { %1264 = vsyncpa [#allocation5], 1 }
 0x2ca   :  { %1266 = vsyncpa [#allocation5 + $0x1], 1 }
 0x2cb   :  { %1267 = vsyncpa [#allocation6], 1 }
 0x2cc   :  { %1269 = vsyncpa [#allocation6 + $0x1], 1 }

</bundles_post_ra>
